<compile_context>
chip_gen: v7x
topology: tpu7x:2x2x1
jax: 0.10.0
libtpu: 0.0.40
codegen_flags: <defaults>
</compile_context>

<pallas_src>
import math
from functools import partial

import jax
import jax.numpy as jnp
from jax.experimental import pallas as pl
from jax.experimental.pallas import tpu as pltpu


# -----------------------------------------------------------------------------
# Fused kernel: whole Wave_Block for Nb batch elements packed along lanes.
# -----------------------------------------------------------------------------
def _make_fused_kernel(C_in, C, L, NbL, K, num_rates, compute_dtype, gating_dtype):
    dilations = [2 ** i for i in range(num_rates)]
    pads = [(d * (K - 1)) // 2 for d in dilations]

    def kernel(x_ref, w0_ref, b0_ref, wfg_ref, bfg_ref, w1_ref, b1_ref, out_ref):
        # x_ref: (C_in, NbL) -- Nb batch segments of length L laid out along lanes.
        x_in = x_ref[...].astype(compute_dtype)

        # Lane position within each length-L batch segment (hoisted; reused by the
        # edge masks of every dilation step).
        local = jax.lax.broadcasted_iota(jnp.int32, (C, NbL), 1) % L

        # Initial 1x1 conv, fp32 accumulation.
        x_f32 = (jnp.dot(w0_ref[...], x_in, preferred_element_type=jnp.float32)
                 + b0_ref[...])
        res = x_f32
        xc = x_f32.astype(compute_dtype)          # cast once at the producer

        for i in range(num_rates):                # static unroll over dilation steps
            d, pad = dilations[i], pads[i]

            # Dilated 'same'-padded taps via lane rotation + edge mask:
            #   tap_k[:, t] = x[:, t + k*d - pad], zero where the read crosses a
            # batch-segment boundary.  pltpu.roll lands on the XLU; the mask is a
            # cheap VPU compare+select -- no lane-misaligned VMEM copies.
            taps = []
            for k in range(K):
                s = pad - k * d                   # rolled[t] = xc[t - s] = xc[t + k*d - pad]
                if s == 0:
                    taps.append(xc)
                else:
                    rolled = pltpu.roll(xc, shift=s % NbL, axis=1)
                    mask = (local >= s) if s > 0 else (local < L + s)
                    taps.append(jnp.where(mask, rolled, jnp.zeros_like(rolled)))
            xt = jnp.concatenate(taps, axis=0)    # (K*C, NbL), sublane-aligned stack

            # One MXU call for both filter and gate branches: (2C, K*C) @ (K*C, NbL).
            fg = (jnp.dot(wfg_ref[i], xt, preferred_element_type=jnp.float32)
                  + bfg_ref[i])
            f = fg[:C].astype(gating_dtype)
            g = fg[C:].astype(gating_dtype)

            # tanh(f) * sigmoid(g), with sigmoid(g) = 0.5*(1 + tanh(g/2)) -> two EUP
            # pushes per element.  gating_dtype is bf16 on v6e/v7x, fp32 on v5e.
            h = jnp.tanh(f) * (0.5 * (jnp.tanh(0.5 * g) + 1.0))

            # 1x1 conv + residual.
            x_f32 = (jnp.dot(w1_ref[i], h.astype(compute_dtype),
                             preferred_element_type=jnp.float32) + b1_ref[i])
            res = res + x_f32
            xc = x_f32.astype(compute_dtype)

        out_ref[...] = res.astype(out_ref.dtype)

    return kernel


# -----------------------------------------------------------------------------
# One-time parameter packing (hoisted out of the kernel / per-step path)
# -----------------------------------------------------------------------------
def _pack_params(params, num_rates, kernel_size, compute_dtype):
    C = params["w0"].shape[0]
    K = kernel_size
    wfg, bfg, w1, b1 = [], [], [], []
    for i in range(num_rates):
        # (C_out, C_in, K) -> (C_out, K, C_in) -> (C_out, K*C_in); col k*C+ci = w[:, ci, k]
        wf = jnp.transpose(params["wf"][i], (0, 2, 1)).reshape(C, K * C)
        wg = jnp.transpose(params["wg"][i], (0, 2, 1)).reshape(C, K * C)
        wfg.append(jnp.concatenate([wf, wg], axis=0))                         # (2C, K*C)
        bfg.append(jnp.concatenate([params["bf"][i], params["bg"][i]]).reshape(2 * C, 1))
        w1.append(params["w1"][i])
        b1.append(params["b1"][i].reshape(C, 1))
    return {
        "w0": params["w0"].astype(compute_dtype),                 # (C, C_in)
        "b0": params["b0"].reshape(C, 1).astype(jnp.float32),     # (C, 1)
        "wfg": jnp.stack(wfg).astype(compute_dtype),              # (R, 2C, K*C)
        "bfg": jnp.stack(bfg).astype(jnp.float32),                # (R, 2C, 1)
        "w1": jnp.stack(w1).astype(compute_dtype),                # (R, C, C)
        "b1": jnp.stack(b1).astype(jnp.float32),                  # (R, C, 1)
    }


# -----------------------------------------------------------------------------
# Forward wrapper
# -----------------------------------------------------------------------------
def _pick_nb(N, L, lane_budget):
    """Largest divisor Nb of N whose (·, Nb*L) block is BlockSpec-legal & fits budget."""
    best = 1
    for nb in range(1, N + 1):
        if N % nb:
            continue
        nbl = nb * L
        if nbl <= lane_budget and (nb == N or nbl % 128 == 0):
            best = nb
    return best


@partial(jax.jit, static_argnames=("num_rates", "kernel_size", "compute_dtype",
                                   "gating_dtype", "lane_budget"))
def wave_block_forward(x, params, *, num_rates, kernel_size,
                       compute_dtype=jnp.bfloat16, gating_dtype=jnp.float32,
                       lane_budget=4096):
    """Pallas implementation of Wave_Block.forward.  x: (N, C_in, L) float32."""
    N, C_in, L = x.shape
    C = params["w0"].shape[0]
    K = kernel_size
    R = num_rates

    for i in range(R):
        if ((K - 1) * (2 ** i)) % 2 != 0:
            # Same constraint as the PyTorch module (res + x would shape-mismatch).
            raise ValueError("kernel_size/dilation combination is not 'same'-padded")

    Nb = _pick_nb(N, L, lane_budget)
    NbL = Nb * L

    # Lane-dense layout: each batch element occupies an aligned length-L lane segment.
    # (Wrapper-side transpose/reshape is pure layout plumbing, done once by XLA.)
    x_flat = jnp.transpose(x, (1, 0, 2)).reshape(C_in, N * L)

    p = _pack_params(params, R, K, compute_dtype)   # cheap; constant-folded under jit
    kernel = _make_fused_kernel(C_in, C, L, NbL, K, R, compute_dtype, gating_dtype)

    out_flat = pl.pallas_call(
        kernel,
        out_shape=jax.ShapeDtypeStruct((C, N * L), jnp.float32),
        grid=(N // Nb,),
        in_specs=[
            pl.BlockSpec((C_in, NbL), lambda b: (0, b)),            # activations
            # Grid-invariant weights (double-buffering cost negligible at C=16).
            pl.BlockSpec((C, C_in), lambda b: (0, 0)),              # w0
            pl.BlockSpec((C, 1), lambda b: (0, 0)),                 # b0
            pl.BlockSpec((R, 2 * C, K * C), lambda b: (0, 0, 0)),   # stacked filter+gate W
            pl.BlockSpec((R, 2 * C, 1), lambda b: (0, 0, 0)),       # stacked filter+gate b
            pl.BlockSpec((R, C, C), lambda b: (0, 0, 0)),           # stacked 1x1 W
            pl.BlockSpec((R, C, 1), lambda b: (0, 0, 0)),           # stacked 1x1 b
        ],
        out_specs=pl.BlockSpec((C, NbL), lambda b: (0, b)),
        compiler_params=pltpu.CompilerParams(dimension_semantics=("parallel",)),
    )(x_flat, p["w0"], p["b0"], p["wfg"], p["bfg"], p["w1"], p["b1"])

    return out_flat.reshape(C, N, L).transpose(1, 0, 2)


# -----------------------------------------------------------------------------
# Deterministic parameter init (PyTorch Conv1d-style uniform bounds)
# -----------------------------------------------------------------------------
def init_params(key, in_channels, out_channels, num_rates, kernel_size):
    def conv_init(key, c_out, c_in, k):
        bound = 1.0 / math.sqrt(c_in * k)
        kw, kb = jax.random.split(key)
        w = jax.random.uniform(kw, (c_out, c_in, k), jnp.float32, -bound, bound)
        b = jax.random.uniform(kb, (c_out,), jnp.float32, -bound, bound)
        return w, b

    keys = jax.random.split(key, 1 + 3 * num_rates)
    w0, b0 = conv_init(keys[0], out_channels, in_channels, 1)
    params = {"w0": w0[:, :, 0], "b0": b0,
              "wf": [], "bf": [], "wg": [], "bg": [], "w1": [], "b1": []}
    for i in range(num_rates):
        wf, bf = conv_init(keys[1 + 3 * i + 0], out_channels, out_channels, kernel_size)
        wg, bg = conv_init(keys[1 + 3 * i + 1], out_channels, out_channels, kernel_size)
        w1, b1 = conv_init(keys[1 + 3 * i + 2], out_channels, out_channels, 1)
        params["wf"].append(wf); params["bf"].append(bf)
        params["wg"].append(wg); params["bg"].append(bg)
        params["w1"].append(w1[:, :, 0]); params["b1"].append(b1)
    return params


# -----------------------------------------------------------------------------
# Plain-JAX reference (for correctness check)
# -----------------------------------------------------------------------------
def _conv1d_ref(x, w, b, dilation=1, padding=0):
    out = jax.lax.conv_general_dilated(
        x, w, window_strides=(1,), padding=[(padding, padding)],
        rhs_dilation=(dilation,), dimension_numbers=("NCH", "OIH", "NCH"))
    return out + b[None, :, None]


def wave_block_ref(x, params, num_rates, kernel_size):
    x = _conv1d_ref(x, params["w0"][:, :, None], params["b0"])
    res = x
    for i in range(num_rates):
        d = 2 ** i
        pad = int(d * (kernel_size - 1) / 2)
        f = _conv1d_ref(x, params["wf"][i], params["bf"][i], dilation=d, padding=pad)
        g = _conv1d_ref(x, params["wg"][i], params["bg"][i], dilation=d, padding=pad)
        x = jnp.tanh(f) * jax.nn.sigmoid(g)
        x = _conv1d_ref(x, params["w1"][i][:, :, None], params["b1"][i])
        res = res + x
    return res


# -----------------------------------------------------------------------------
if __name__ == "__main__":
    N, C_IN, C_OUT, L = 2, 4, 16, 256      # L multiple of 128 -> aligned lane segments
    NUM_RATES, K = 3, 3

    key = jax.random.PRNGKey(0)
    kx, kp = jax.random.split(key)
    x = jax.random.normal(kx, (N, C_IN, L), jnp.float32)
    params = init_params(kp, C_IN, C_OUT, NUM_RATES, K)

    ref = jax.block_until_ready(wave_block_ref(x, params, NUM_RATES, K))

    # Strict numerical check: fp32 matmuls + fp32 gating (test-only path).
    out_f32 = jax.block_until_ready(
        wave_block_forward(x, params, num_rates=NUM_RATES, kernel_size=K,
                           compute_dtype=jnp.float32, gating_dtype=jnp.float32))
    assert out_f32.shape == (N, C_OUT, L)
    assert jnp.allclose(out_f32, ref, atol=1e-3, rtol=1e-3), "fp32 mismatch vs reference"

    # Production configuration: bf16 MXU operands everywhere; bf16 gating only on
    # chips with a bf16 VPU/EUP (v6e/v7x), fp32 gating on v5e and older.
    kind = jax.devices()[0].device_kind.lower()
    gating = jnp.bfloat16 if ("v6" in kind or "v7" in kind) else jnp.float32
    out_bf16 = jax.block_until_ready(
        wave_block_forward(x, params, num_rates=NUM_RATES, kernel_size=K,
                           compute_dtype=jnp.bfloat16, gating_dtype=gating))
    assert out_bf16.shape == (N, C_OUT, L)
    assert jnp.allclose(out_bf16, ref, atol=5e-2, rtol=5e-2), "bf16 mismatch vs reference"

    print("KERNEL_OK")
</pallas_src>

<mosaic_0001>
module attributes {stable_mosaic.version = 11 : i64} {
  func.func @kernel(%arg0: i32, %arg1: memref<4x512xf32, #tpu.memory_space<vmem>>, %arg2: memref<16x4xf32, #tpu.memory_space<vmem>>, %arg3: memref<16x1xf32, #tpu.memory_space<vmem>>, %arg4: memref<3x32x48xf32, #tpu.memory_space<vmem>>, %arg5: memref<3x32x1xf32, #tpu.memory_space<vmem>>, %arg6: memref<3x16x16xf32, #tpu.memory_space<vmem>>, %arg7: memref<3x16x1xf32, #tpu.memory_space<vmem>>, %arg8: memref<16x512xf32, #tpu.memory_space<vmem>>) attributes {dimension_semantics = [#tpu.dimension_semantics<parallel>], iteration_bounds = array<i64: 1>, scalar_prefetch = 0 : i64, scratch_operands = 0 : i64, tpu.core_type = #tpu.core_type<tc>, window_params = [{transform_indices = @transform_0, window_bounds = array<i64: 4, 512>}, {pipeline_mode = #tpu.pipeline_mode<synchronous>, transform_indices = @transform_1, window_bounds = array<i64: 16, 4>}, {pipeline_mode = #tpu.pipeline_mode<synchronous>, transform_indices = @transform_2, window_bounds = array<i64: 16, 1>}, {pipeline_mode = #tpu.pipeline_mode<synchronous>, transform_indices = @transform_3, window_bounds = array<i64: 3, 32, 48>}, {pipeline_mode = #tpu.pipeline_mode<synchronous>, transform_indices = @transform_4, window_bounds = array<i64: 3, 32, 1>}, {pipeline_mode = #tpu.pipeline_mode<synchronous>, transform_indices = @transform_5, window_bounds = array<i64: 3, 16, 16>}, {pipeline_mode = #tpu.pipeline_mode<synchronous>, transform_indices = @transform_6, window_bounds = array<i64: 3, 16, 1>}, {transform_indices = @transform_7, window_bounds = array<i64: 16, 512>}]} {
    %c0 = arith.constant 0 : index
    %c0_0 = arith.constant 0 : index
    %0 = vector.load %arg1[%c0, %c0_0] : memref<4x512xf32, #tpu.memory_space<vmem>>, vector<4x512xf32>
    %1 = tpu.iota {dimensions = array<i32: 1>} : vector<16x512xi32>
    %c256_i32 = arith.constant 256 : i32
    %c0_i32 = arith.constant 0 : i32
    %2 = arith.cmpi eq, %c256_i32, %c0_i32 : i32
    %c1_i32 = arith.constant 1 : i32
    %3 = arith.select %2, %c1_i32, %c256_i32 : i32
    %4 = vector.broadcast %3 : i32 to vector<16x512xi32>
    %5 = arith.remsi %1, %4 : vector<16x512xi32>
    %c0_i32_1 = arith.constant 0 : i32
    %6 = vector.broadcast %c0_i32_1 : i32 to vector<16x512xi32>
    %7 = arith.cmpi ne, %5, %6 : vector<16x512xi32>
    %c0_i32_2 = arith.constant 0 : i32
    %8 = vector.broadcast %c0_i32_2 : i32 to vector<16x512xi32>
    %9 = arith.cmpi slt, %5, %8 : vector<16x512xi32>
    %c0_i32_3 = arith.constant 0 : i32
    %10 = arith.cmpi slt, %3, %c0_i32_3 : i32
    %11 = vector.broadcast %10 : i1 to vector<16x512xi1>
    %12 = vector.broadcast %11 : vector<16x512xi1> to vector<16x512xi1>
    %13 = arith.xori %9, %12 : vector<16x512xi1>
    %14 = arith.andi %13, %7 : vector<16x512xi1>
    %15 = vector.broadcast %3 : i32 to vector<16x512xi32>
    %16 = arith.addi %5, %15 : vector<16x512xi32>
    %17 = arith.select %14, %16, %5 : vector<16x512xi1>, vector<16x512xi32>
    %c0_4 = arith.constant 0 : index
    %c0_5 = arith.constant 0 : index
    %18 = vector.load %arg2[%c0_4, %c0_5] : memref<16x4xf32, #tpu.memory_space<vmem>>, vector<16x4xf32>
    %cst = arith.constant dense<0.000000e+00> : vector<16x512xf32>
    %19 = tpu.matmul %18, %0, %cst {dimension_numbers = #tpu.dot_dimension_numbers<[1], [0], [0], [1], [0, 0, 1, 1], [], []>} : vector<16x4xf32>, vector<4x512xf32>, vector<16x512xf32> -> vector<16x512xf32>
    %c0_6 = arith.constant 0 : index
    %c0_7 = arith.constant 0 : index
    %20 = vector.load %arg3[%c0_6, %c0_7] : memref<16x1xf32, #tpu.memory_space<vmem>>, vector<16x1xf32>
    %21 = vector.broadcast %20 : vector<16x1xf32> to vector<16x512xf32>
    %22 = arith.addf %19, %21 : vector<16x512xf32>
    %c1_i32_8 = arith.constant 1 : i32
    %23 = tpu.dynamic_rotate %22 by %c1_i32_8 dim 1 : vector<16x512xf32>, i32 -> vector<16x512xf32>
    %c1_i32_9 = arith.constant 1 : i32
    %24 = vector.broadcast %c1_i32_9 : i32 to vector<16x512xi32>
    %25 = arith.cmpi sge, %17, %24 : vector<16x512xi32>
    %cst_10 = arith.constant 0.000000e+00 : f32
    %26 = vector.broadcast %cst_10 : f32 to vector<16x512xf32>
    %27 = arith.select %25, %23, %26 : vector<16x512xi1>, vector<16x512xf32>
    %c511_i32 = arith.constant 511 : i32
    %28 = tpu.dynamic_rotate %22 by %c511_i32 dim 1 : vector<16x512xf32>, i32 -> vector<16x512xf32>
    %c255_i32 = arith.constant 255 : i32
    %29 = vector.broadcast %c255_i32 : i32 to vector<16x512xi32>
    %30 = arith.cmpi slt, %17, %29 : vector<16x512xi32>
    %cst_11 = arith.constant 0.000000e+00 : f32
    %31 = vector.broadcast %cst_11 : f32 to vector<16x512xf32>
    %32 = arith.select %30, %28, %31 : vector<16x512xi1>, vector<16x512xf32>
    %33 = tpu.concatenate %27, %22, %32 in 0 : vector<16x512xf32>, vector<16x512xf32>, vector<16x512xf32> -> vector<48x512xf32>
    %c0_12 = arith.constant 0 : index
    %c0_13 = arith.constant 0 : index
    %c0_14 = arith.constant 0 : index
    %34 = vector.load %arg4[%c0_12, %c0_13, %c0_14] : memref<3x32x48xf32, #tpu.memory_space<vmem>>, vector<1x32x48xf32>
    %35 = vector.shape_cast %34 : vector<1x32x48xf32> to vector<32x48xf32>
    %cst_15 = arith.constant dense<0.000000e+00> : vector<32x512xf32>
    %36 = tpu.matmul %35, %33, %cst_15 {dimension_numbers = #tpu.dot_dimension_numbers<[1], [0], [0], [1], [0, 0, 1, 1], [], []>} : vector<32x48xf32>, vector<48x512xf32>, vector<32x512xf32> -> vector<32x512xf32>
    %c0_16 = arith.constant 0 : index
    %c0_17 = arith.constant 0 : index
    %c0_18 = arith.constant 0 : index
    %37 = vector.load %arg5[%c0_16, %c0_17, %c0_18] : memref<3x32x1xf32, #tpu.memory_space<vmem>>, vector<1x32x1xf32>
    %38 = vector.shape_cast %37 : vector<1x32x1xf32> to vector<32x1xf32>
    %39 = vector.broadcast %38 : vector<32x1xf32> to vector<32x512xf32>
    %40 = arith.addf %36, %39 : vector<32x512xf32>
    %41 = vector.extract_strided_slice %40 {offsets = [0, 0], sizes = [16, 512], strides = [1, 1]} : vector<32x512xf32> to vector<16x512xf32>
    %42 = vector.extract_strided_slice %40 {offsets = [16, 0], sizes = [16, 512], strides = [1, 1]} : vector<32x512xf32> to vector<16x512xf32>
    %43 = math.tanh %41 : vector<16x512xf32>
    %cst_19 = arith.constant 5.000000e-01 : f32
    %44 = vector.broadcast %cst_19 : f32 to vector<16x512xf32>
    %45 = arith.mulf %44, %42 : vector<16x512xf32>
    %46 = math.tanh %45 : vector<16x512xf32>
    %cst_20 = arith.constant 1.000000e+00 : f32
    %47 = vector.broadcast %cst_20 : f32 to vector<16x512xf32>
    %48 = arith.addf %46, %47 : vector<16x512xf32>
    %cst_21 = arith.constant 5.000000e-01 : f32
    %49 = vector.broadcast %cst_21 : f32 to vector<16x512xf32>
    %50 = arith.mulf %49, %48 : vector<16x512xf32>
    %51 = arith.mulf %43, %50 : vector<16x512xf32>
    %c0_22 = arith.constant 0 : index
    %c0_23 = arith.constant 0 : index
    %c0_24 = arith.constant 0 : index
    %52 = vector.load %arg6[%c0_22, %c0_23, %c0_24] : memref<3x16x16xf32, #tpu.memory_space<vmem>>, vector<1x16x16xf32>
    %53 = vector.shape_cast %52 : vector<1x16x16xf32> to vector<16x16xf32>
    %cst_25 = arith.constant dense<0.000000e+00> : vector<16x512xf32>
    %54 = tpu.matmul %53, %51, %cst_25 {dimension_numbers = #tpu.dot_dimension_numbers<[1], [0], [0], [1], [0, 0, 1, 1], [], []>} : vector<16x16xf32>, vector<16x512xf32>, vector<16x512xf32> -> vector<16x512xf32>
    %c0_26 = arith.constant 0 : index
    %c0_27 = arith.constant 0 : index
    %c0_28 = arith.constant 0 : index
    %55 = vector.load %arg7[%c0_26, %c0_27, %c0_28] : memref<3x16x1xf32, #tpu.memory_space<vmem>>, vector<1x16x1xf32>
    %56 = vector.shape_cast %55 : vector<1x16x1xf32> to vector<16x1xf32>
    %57 = vector.broadcast %56 : vector<16x1xf32> to vector<16x512xf32>
    %58 = arith.addf %54, %57 : vector<16x512xf32>
    %59 = arith.addf %22, %58 : vector<16x512xf32>
    %c2_i32 = arith.constant 2 : i32
    %60 = tpu.dynamic_rotate %58 by %c2_i32 dim 1 : vector<16x512xf32>, i32 -> vector<16x512xf32>
    %c2_i32_29 = arith.constant 2 : i32
    %61 = vector.broadcast %c2_i32_29 : i32 to vector<16x512xi32>
    %62 = arith.cmpi sge, %17, %61 : vector<16x512xi32>
    %cst_30 = arith.constant 0.000000e+00 : f32
    %63 = vector.broadcast %cst_30 : f32 to vector<16x512xf32>
    %64 = arith.select %62, %60, %63 : vector<16x512xi1>, vector<16x512xf32>
    %c510_i32 = arith.constant 510 : i32
    %65 = tpu.dynamic_rotate %58 by %c510_i32 dim 1 : vector<16x512xf32>, i32 -> vector<16x512xf32>
    %c254_i32 = arith.constant 254 : i32
    %66 = vector.broadcast %c254_i32 : i32 to vector<16x512xi32>
    %67 = arith.cmpi slt, %17, %66 : vector<16x512xi32>
    %cst_31 = arith.constant 0.000000e+00 : f32
    %68 = vector.broadcast %cst_31 : f32 to vector<16x512xf32>
    %69 = arith.select %67, %65, %68 : vector<16x512xi1>, vector<16x512xf32>
    %70 = tpu.concatenate %64, %58, %69 in 0 : vector<16x512xf32>, vector<16x512xf32>, vector<16x512xf32> -> vector<48x512xf32>
    %c1 = arith.constant 1 : index
    %c0_32 = arith.constant 0 : index
    %c0_33 = arith.constant 0 : index
    %71 = vector.load %arg4[%c1, %c0_32, %c0_33] : memref<3x32x48xf32, #tpu.memory_space<vmem>>, vector<1x32x48xf32>
    %72 = vector.shape_cast %71 : vector<1x32x48xf32> to vector<32x48xf32>
    %cst_34 = arith.constant dense<0.000000e+00> : vector<32x512xf32>
    %73 = tpu.matmul %72, %70, %cst_34 {dimension_numbers = #tpu.dot_dimension_numbers<[1], [0], [0], [1], [0, 0, 1, 1], [], []>} : vector<32x48xf32>, vector<48x512xf32>, vector<32x512xf32> -> vector<32x512xf32>
    %c1_35 = arith.constant 1 : index
    %c0_36 = arith.constant 0 : index
    %c0_37 = arith.constant 0 : index
    %74 = vector.load %arg5[%c1_35, %c0_36, %c0_37] : memref<3x32x1xf32, #tpu.memory_space<vmem>>, vector<1x32x1xf32>
    %75 = vector.shape_cast %74 : vector<1x32x1xf32> to vector<32x1xf32>
    %76 = vector.broadcast %75 : vector<32x1xf32> to vector<32x512xf32>
    %77 = arith.addf %73, %76 : vector<32x512xf32>
    %78 = vector.extract_strided_slice %77 {offsets = [0, 0], sizes = [16, 512], strides = [1, 1]} : vector<32x512xf32> to vector<16x512xf32>
    %79 = vector.extract_strided_slice %77 {offsets = [16, 0], sizes = [16, 512], strides = [1, 1]} : vector<32x512xf32> to vector<16x512xf32>
    %80 = math.tanh %78 : vector<16x512xf32>
    %cst_38 = arith.constant 5.000000e-01 : f32
    %81 = vector.broadcast %cst_38 : f32 to vector<16x512xf32>
    %82 = arith.mulf %81, %79 : vector<16x512xf32>
    %83 = math.tanh %82 : vector<16x512xf32>
    %cst_39 = arith.constant 1.000000e+00 : f32
    %84 = vector.broadcast %cst_39 : f32 to vector<16x512xf32>
    %85 = arith.addf %83, %84 : vector<16x512xf32>
    %cst_40 = arith.constant 5.000000e-01 : f32
    %86 = vector.broadcast %cst_40 : f32 to vector<16x512xf32>
    %87 = arith.mulf %86, %85 : vector<16x512xf32>
    %88 = arith.mulf %80, %87 : vector<16x512xf32>
    %c1_41 = arith.constant 1 : index
    %c0_42 = arith.constant 0 : index
    %c0_43 = arith.constant 0 : index
    %89 = vector.load %arg6[%c1_41, %c0_42, %c0_43] : memref<3x16x16xf32, #tpu.memory_space<vmem>>, vector<1x16x16xf32>
    %90 = vector.shape_cast %89 : vector<1x16x16xf32> to vector<16x16xf32>
    %cst_44 = arith.constant dense<0.000000e+00> : vector<16x512xf32>
    %91 = tpu.matmul %90, %88, %cst_44 {dimension_numbers = #tpu.dot_dimension_numbers<[1], [0], [0], [1], [0, 0, 1, 1], [], []>} : vector<16x16xf32>, vector<16x512xf32>, vector<16x512xf32> -> vector<16x512xf32>
    %c1_45 = arith.constant 1 : index
    %c0_46 = arith.constant 0 : index
    %c0_47 = arith.constant 0 : index
    %92 = vector.load %arg7[%c1_45, %c0_46, %c0_47] : memref<3x16x1xf32, #tpu.memory_space<vmem>>, vector<1x16x1xf32>
    %93 = vector.shape_cast %92 : vector<1x16x1xf32> to vector<16x1xf32>
    %94 = vector.broadcast %93 : vector<16x1xf32> to vector<16x512xf32>
    %95 = arith.addf %91, %94 : vector<16x512xf32>
    %96 = arith.addf %59, %95 : vector<16x512xf32>
    %c4_i32 = arith.constant 4 : i32
    %97 = tpu.dynamic_rotate %95 by %c4_i32 dim 1 : vector<16x512xf32>, i32 -> vector<16x512xf32>
    %c4_i32_48 = arith.constant 4 : i32
    %98 = vector.broadcast %c4_i32_48 : i32 to vector<16x512xi32>
    %99 = arith.cmpi sge, %17, %98 : vector<16x512xi32>
    %cst_49 = arith.constant 0.000000e+00 : f32
    %100 = vector.broadcast %cst_49 : f32 to vector<16x512xf32>
    %101 = arith.select %99, %97, %100 : vector<16x512xi1>, vector<16x512xf32>
    %c508_i32 = arith.constant 508 : i32
    %102 = tpu.dynamic_rotate %95 by %c508_i32 dim 1 : vector<16x512xf32>, i32 -> vector<16x512xf32>
    %c252_i32 = arith.constant 252 : i32
    %103 = vector.broadcast %c252_i32 : i32 to vector<16x512xi32>
    %104 = arith.cmpi slt, %17, %103 : vector<16x512xi32>
    %cst_50 = arith.constant 0.000000e+00 : f32
    %105 = vector.broadcast %cst_50 : f32 to vector<16x512xf32>
    %106 = arith.select %104, %102, %105 : vector<16x512xi1>, vector<16x512xf32>
    %107 = tpu.concatenate %101, %95, %106 in 0 : vector<16x512xf32>, vector<16x512xf32>, vector<16x512xf32> -> vector<48x512xf32>
    %c2 = arith.constant 2 : index
    %c0_51 = arith.constant 0 : index
    %c0_52 = arith.constant 0 : index
    %108 = vector.load %arg4[%c2, %c0_51, %c0_52] : memref<3x32x48xf32, #tpu.memory_space<vmem>>, vector<1x32x48xf32>
    %109 = vector.shape_cast %108 : vector<1x32x48xf32> to vector<32x48xf32>
    %cst_53 = arith.constant dense<0.000000e+00> : vector<32x512xf32>
    %110 = tpu.matmul %109, %107, %cst_53 {dimension_numbers = #tpu.dot_dimension_numbers<[1], [0], [0], [1], [0, 0, 1, 1], [], []>} : vector<32x48xf32>, vector<48x512xf32>, vector<32x512xf32> -> vector<32x512xf32>
    %c2_54 = arith.constant 2 : index
    %c0_55 = arith.constant 0 : index
    %c0_56 = arith.constant 0 : index
    %111 = vector.load %arg5[%c2_54, %c0_55, %c0_56] : memref<3x32x1xf32, #tpu.memory_space<vmem>>, vector<1x32x1xf32>
    %112 = vector.shape_cast %111 : vector<1x32x1xf32> to vector<32x1xf32>
    %113 = vector.broadcast %112 : vector<32x1xf32> to vector<32x512xf32>
    %114 = arith.addf %110, %113 : vector<32x512xf32>
    %115 = vector.extract_strided_slice %114 {offsets = [0, 0], sizes = [16, 512], strides = [1, 1]} : vector<32x512xf32> to vector<16x512xf32>
    %116 = vector.extract_strided_slice %114 {offsets = [16, 0], sizes = [16, 512], strides = [1, 1]} : vector<32x512xf32> to vector<16x512xf32>
    %117 = math.tanh %115 : vector<16x512xf32>
    %cst_57 = arith.constant 5.000000e-01 : f32
    %118 = vector.broadcast %cst_57 : f32 to vector<16x512xf32>
    %119 = arith.mulf %118, %116 : vector<16x512xf32>
    %120 = math.tanh %119 : vector<16x512xf32>
    %cst_58 = arith.constant 1.000000e+00 : f32
    %121 = vector.broadcast %cst_58 : f32 to vector<16x512xf32>
    %122 = arith.addf %120, %121 : vector<16x512xf32>
    %cst_59 = arith.constant 5.000000e-01 : f32
    %123 = vector.broadcast %cst_59 : f32 to vector<16x512xf32>
    %124 = arith.mulf %123, %122 : vector<16x512xf32>
    %125 = arith.mulf %117, %124 : vector<16x512xf32>
    %c2_60 = arith.constant 2 : index
    %c0_61 = arith.constant 0 : index
    %c0_62 = arith.constant 0 : index
    %126 = vector.load %arg6[%c2_60, %c0_61, %c0_62] : memref<3x16x16xf32, #tpu.memory_space<vmem>>, vector<1x16x16xf32>
    %127 = vector.shape_cast %126 : vector<1x16x16xf32> to vector<16x16xf32>
    %cst_63 = arith.constant dense<0.000000e+00> : vector<16x512xf32>
    %128 = tpu.matmul %127, %125, %cst_63 {dimension_numbers = #tpu.dot_dimension_numbers<[1], [0], [0], [1], [0, 0, 1, 1], [], []>} : vector<16x16xf32>, vector<16x512xf32>, vector<16x512xf32> -> vector<16x512xf32>
    %c2_64 = arith.constant 2 : index
    %c0_65 = arith.constant 0 : index
    %c0_66 = arith.constant 0 : index
    %129 = vector.load %arg7[%c2_64, %c0_65, %c0_66] : memref<3x16x1xf32, #tpu.memory_space<vmem>>, vector<1x16x1xf32>
    %130 = vector.shape_cast %129 : vector<1x16x1xf32> to vector<16x1xf32>
    %131 = vector.broadcast %130 : vector<16x1xf32> to vector<16x512xf32>
    %132 = arith.addf %128, %131 : vector<16x512xf32>
    %133 = arith.addf %96, %132 : vector<16x512xf32>
    %c0_67 = arith.constant 0 : index
    %c0_68 = arith.constant 0 : index
    %134 = vector.load %arg8[%c0_67, %c0_68] : memref<16x512xf32, #tpu.memory_space<vmem>>, vector<16x512xf32>
    tpu.vector_store %arg8[%c0_67, %c0_68], %133 {strides = array<i32>} : memref<16x512xf32, #tpu.memory_space<vmem>>, vector<16x512xf32>,
    return
  }
  func.func @transform_0(%arg0: i32) -> (i32, i32) {
    %c0_i32 = arith.constant 0 : i32
    %c0_i32_0 = arith.constant 0 : i32
    return %c0_i32, %arg0 : i32, i32
  }
  func.func @transform_1(%arg0: i32) -> (i32, i32) {
    %c0_i32 = arith.constant 0 : i32
    %c0_i32_0 = arith.constant 0 : i32
    %c0_i32_1 = arith.constant 0 : i32
    return %c0_i32, %c0_i32_0 : i32, i32
  }
  func.func @transform_2(%arg0: i32) -> (i32, i32) {
    %c0_i32 = arith.constant 0 : i32
    %c0_i32_0 = arith.constant 0 : i32
    %c0_i32_1 = arith.constant 0 : i32
    return %c0_i32, %c0_i32_0 : i32, i32
  }
  func.func @transform_3(%arg0: i32) -> (i32, i32, i32) {
    %c0_i32 = arith.constant 0 : i32
    %c0_i32_0 = arith.constant 0 : i32
    %c0_i32_1 = arith.constant 0 : i32
    %c0_i32_2 = arith.constant 0 : i32
    return %c0_i32, %c0_i32_0, %c0_i32_1 : i32, i32, i32
  }
  func.func @transform_4(%arg0: i32) -> (i32, i32, i32) {
    %c0_i32 = arith.constant 0 : i32
    %c0_i32_0 = arith.constant 0 : i32
    %c0_i32_1 = arith.constant 0 : i32
    %c0_i32_2 = arith.constant 0 : i32
    return %c0_i32, %c0_i32_0, %c0_i32_1 : i32, i32, i32
  }
  func.func @transform_5(%arg0: i32) -> (i32, i32, i32) {
    %c0_i32 = arith.constant 0 : i32
    %c0_i32_0 = arith.constant 0 : i32
    %c0_i32_1 = arith.constant 0 : i32
    %c0_i32_2 = arith.constant 0 : i32
    return %c0_i32, %c0_i32_0, %c0_i32_1 : i32, i32, i32
  }
  func.func @transform_6(%arg0: i32) -> (i32, i32, i32) {
    %c0_i32 = arith.constant 0 : i32
    %c0_i32_0 = arith.constant 0 : i32
    %c0_i32_1 = arith.constant 0 : i32
    %c0_i32_2 = arith.constant 0 : i32
    return %c0_i32, %c0_i32_0, %c0_i32_1 : i32, i32, i32
  }
  func.func @transform_7(%arg0: i32) -> (i32, i32) {
    %c0_i32 = arith.constant 0 : i32
    %c0_i32_0 = arith.constant 0 : i32
    return %c0_i32, %arg0 : i32, i32
  }
}

</mosaic_0001>

<bundles_post_ra>
// kernel: wave_block_forward.1
= control target key start
LH: loop header
LB: loop body
LE: loop exit
PB: predicated region body
PF: predicated region fallthrough
CT: control target
= control target key end

     0   :  { %vm106_vm0 = vcmask 1043456   ;;  %v2285_v2 = vmov 0.0   ;;  %v2286_v5 = vmov 0   ;;  %vm99_vm1 = vcmask 31744   ;;  %s2875_s0 = inlined_call_operand.vmem [shape: f32[4,512], index: 0, kind: input, shape index: {}]   ;;  %s2876_s1 = inlined_call_operand.vmem [shape: f32[16,4], index: 1, kind: input, shape index: {}]   ;;  %s2877_s2 = inlined_call_operand.vmem [shape: f32[16,1], index: 2, kind: input, shape index: {}]   ;;  %s2878_s4 = inlined_call_operand.vmem [shape: f32[3,32,1], index: 4, kind: input, shape index: {}]   ;;  %s2879_s6 = inlined_call_operand.vmem [shape: f32[3,16,1], index: 6, kind: input, shape index: {}]   ;;  %s2880_s3 = inlined_call_operand.vmem [shape: f32[3,32,48], index: 3, kind: input, shape index: {}]   ;;  %s2881_s5 = inlined_call_operand.vmem [shape: f32[3,16,16], index: 5, kind: input, shape index: {}]   ;;  %s2882_s7 = inlined_call_operand.vmem [shape: f32[16,512], index: 7, kind: output, shape index: {}]  }
   0x1   :  { %v26_v0 = vld [vmem:[%s2875_s0] sm:$0xff]  ;;  %v27_v1 = vld [vmem:[%s2875_s0 + $0x8] sm:$0xff]  ;;  %179 = vmatprep.mubr.f32.mxu0 %v2285_v2  ;;  %256 = vmatprep.mubr.f32.mxu1 %v2285_v2  ;;  %v349_v32 = vld [vmem:[%s2878_s4 + $0x10] sm:$0xff]  ;;  %v28_v38 = vlaneseq  ;;  %vm371_vm12 = vcmask 392192   ;;  %vm624_vm13 = vcmask 130048  }
   0x2   :  { %v97_v3 = vcombine.high %v26_v0, %v26_v0  ;;  %v98_v4 = vcombine.high %v27_v1, %v27_v1  ;;  %2065 = vset.pattern.permute.xlu0 %v2286_v5  ;;  %v83_v6 = vld [vmem:[%s2877_s2] sm:$0xff]  ;;  %2106 = vset.pattern.permute.xlu1 %v2286_v5  ;;  %v84_v8 = vld [vmem:[%s2877_s2 + $0x8] sm:$0xff]  ;;  %s2288_s2 = smov 127   ;;  %v350_v35 = vld [vmem:[%s2878_s4 + $0x18] sm:$0xff] }
   0x3   :  { %v81_v7 = vld [vmem:[%s2876_s1] sm:$0xff]  ;;  %87 = vperm.xlu0 %2065, %v83_v6   ;;  %v82_v9 = vld [vmem:[%s2876_s1 + $0x8] sm:$0xff]  ;;  %s2287_s1 = smov 1   ;;  %v2403_v41 = vand.u32 127, %v28_v38 }
   0x4   :  { %1857 = vmatprep.subr.msk.mxu0 %vm106_vm0, %v97_v3  ;;  %1861 = vmatprep.subr.msk.mxu1 %vm106_vm0, %v98_v4  ;;  %v347_v33 = vld [vmem:[%s2878_s4] sm:$0xff]  ;;  %v348_v36 = vld [vmem:[%s2878_s4 + $0x8] sm:$0xff] }
   0x5   :  { %1858 = vmatpush1.msk.msra.mxu0 %vm106_vm0, %v26_v0  ;;  %1862 = vmatpush1.msk.msra.mxu1 %vm106_vm0, %v27_v1  ;;  %v612_v34 = vld [vmem:[%s2879_s6] sm:$0xff]  ;;  %v613_v37 = vld [vmem:[%s2879_s6 + $0x8] sm:$0xff]  ;;  %v31_v42 = vadd.s32 256, %v2403_v41  ;;  %v2407_v43 = vand.u32 255, %v2403_v41  ;;  %v30_v44 = vadd.s32 128, %v2403_v41  ;;  %vm285_vm2 = vcmp.lt.s32.totalorder %v2403_v41, 1 }
   0x6   :  { %1859 = vmatmul.mubr.msk.f32.vlgmr.msra.gmra.mrb[0].mxu0 %vm99_vm1, %v81_v7  ;;  %1863 = vmatmul.mubr.msk.f32.vlgmr.msra.gmra.mrb[0].mxu1 %vm99_vm1, %v81_v7  ;;  %v32_v59 = vadd.s32 384, %v2403_v41  ;;  %vm322_vm4 = vcmp.lt.s32.totalorder %v2403_v41, 127  ;;  %vm809_vm14 = vcmp.lt.s32.totalorder %v2403_v41, 2 }
   0x7   :  { %185 = vmatprep.mubr.f32.mxu0 %v2285_v2  ;;  %262 = vmatprep.mubr.f32.mxu1 %v2285_v2  ;;  %v2413_v51 = vand.u32 255, %v31_v42  ;;  %vm294_vm3 = vcmp.ge.s32.totalorder %v2407_v43, 1  ;;  %v2420_v54 = vand.u32 255, %v30_v44  ;;  %vm818_vm15 = vcmp.ge.s32.totalorder %v2407_v43, 2 }
   0x8   :  { %92 = vperm.xlu0 %2065, %v84_v8   ;;  %vm1952_vm6 = vmpackc.low %vm294_vm3, %vm294_vm3  ;;  %vm846_vm3 = vcmp.lt.s32.totalorder %v2403_v41, 126 }
   0x9   :  { %vm296_vm5 = vcmp.ge.s32.totalorder %v2413_v51, 1  ;;  %vm332_vm7 = vcmp.lt.s32.totalorder %v2420_v54, 255  ;;  %vm820_vm0 = vcmp.ge.s32.totalorder %v2413_v51, 2 }
   0xa   :  { %1860 = vmatmul.mubr.msk.f32.gmra.mrb[2].mxu0 %vm99_vm1, %v82_v9  ;;  %1864 = vmatmul.mubr.msk.f32.gmra.mrb[2].mxu1 %vm99_vm1, %v82_v9  ;;  %vm1966_vm8 = vmpackc.low %vm296_vm5, %vm296_vm5 }
   0xb   :  { %448 = vmatprep.mubr.f32.mxu0 %v2285_v2  ;;  %537 = vmatprep.mubr.f32.mxu1 %v2285_v2  ;;  %vm1959_vm9 = vmpackc.low %vm332_vm7, %vm332_vm7 }
   0xc   :  { %vm1988_vm1 = vmpackc.low %vm818_vm15, %vm818_vm15  ;;  %vm1372_vm15 = vcmp.lt.s32.totalorder %v2403_v41, 124 }
  0x82   :  { %v88_v10 = vpop.permute.xlu0 %87 }
  0x87   :  { %v93_v15 = vpop.permute.xlu0 %92 }
  0xd9   :  { %v181_v11 = vpop.f32.mrb[0].mxu0  ;;  %v258_v12 = vpop.f32.mrb[0].mxu1 }
  0xda   :  { %v183_v13 = vpop.f32.mrb[1].mxu0  ;;  %v260_v14 = vpop.f32.mrb[1].mxu1  ;;  %v2361_v18 = vadd.f32 %v181_v11, %v88_v10  ;;  %v2363_v19 = vadd.f32 %v258_v12, %v88_v10 }
  0xdb   :  { %v2375_v27 = vadd.f32 %v183_v13, %v88_v10  ;;  %v2381_v30 = vadd.f32 %v260_v14, %v88_v10  ;;  %v2443_v10 = vand.u32 255, %v32_v59 }
  0xdd   :  { %v187_v16 = vpop.f32.mrb[2].mxu0  ;;  %v264_v17 = vpop.f32.mrb[2].mxu1  ;;  %vm334_vm10 = vcmp.lt.s32.totalorder %v2443_v10, 255  ;;  %vm858_vm5 = vcmp.lt.s32.totalorder %v2443_v10, 254 }
  0xde   :  { %v2365_v20 = vadd.f32 %v187_v16, %v93_v15  ;;  %v2367_v21 = vadd.f32 %v264_v17, %v93_v15  ;;  %v189_v22 = vpop.f32.mrb[3].mxu0  ;;  %v266_v23 = vpop.f32.mrb[3].mxu1  ;;  %vm1973_vm11 = vmpackc.low %vm334_vm10, %vm334_vm10  ;;  %vm1346_vm10 = vcmp.ge.s32.totalorder %v2413_v51, 4 }
  0xdf   :  { %v2369_v24 = vadd.f32 %v189_v22, %v93_v15  ;;  %v2377_v28 = vadd.f32 %v266_v23, %v93_v15  ;;  %vm2009_vm7 = vmpackc.low %vm858_vm5, %vm858_vm5 }
  0xe0   :  { %v2071_v25 = vpack.i.bf16 %v2367_v21, %v2363_v19  ;;  %v2066_v26 = vpack.i.bf16 %v2365_v20, %v2361_v18 }
  0xe1   :  { %v2086_v29 = vpack.i.bf16 %v2369_v24, %v2375_v27  ;;  %v2091_v31 = vpack.i.bf16 %v2377_v28, %v2381_v30  ;;  %v1954_v1 = vpack.c.bf16 %v2369_v24, %v2375_v27  ;;  %v1968_v16 = vpack.c.bf16 %v2377_v28, %v2381_v30 }
  0xe2   :  { %2072 = vrot.lane.b32.xlu0 %v2071_v25, %s2287_s1  ;;  %2067 = vrot.lane.b32.xlu1 %v2066_v26, %s2287_s1 }
  0xe6   :  { %2077 = vrot.lane.b32.xlu0 %v2066_v26, %s2288_s2  ;;  %2087 = vrot.lane.b32.xlu1 %v2086_v29, %s2287_s1 }
  0xea   :  { %2082 = vrot.lane.b32.xlu0 %v2071_v25, %s2288_s2  ;;  %2092 = vrot.lane.b32.xlu1 %v2091_v31, %s2287_s1  ;;  %s2289_s1 = smov 2  }
  0xee   :  { %363 = vperm.xlu0 %2065, %v349_v32   ;;  %2097 = vrot.lane.b32.xlu1 %v2086_v29, %s2288_s2 }
  0xf2   :  { %353 = vperm.xlu0 %2065, %v347_v33   ;;  %2102 = vrot.lane.b32.xlu1 %v2091_v31, %s2288_s2  ;;  %v1956_v31 = vpack.c.bf16 %v2365_v20, %v2361_v18  ;;  %s2290_s2 = smov 126  }
  0xf6   :  { %616 = vperm.xlu0 %2065, %v612_v34   ;;  %368 = vperm.xlu1 %2106, %v350_v35  }
  0xfa   :  { %358 = vperm.xlu1 %2106, %v348_v36   ;;  %v1970_v36 = vpack.c.bf16 %v2367_v21, %v2363_v19 }
  0xfe   :  { %621 = vperm.xlu1 %2106, %v613_v37  }
 0x154   :  { %v2073_v39 = vpop.permute.xlu0 %2072  ;;  %v2068_v40 = vpop.permute.xlu1 %2067 }
 0x155   :  { %v2070_v47 = vunpack.i.h.bf16 %v2068_v40  ;;  %v2069_v48 = vunpack.i.l.bf16 %v2068_v40  ;;  %v2075_v55 = vunpack.i.h.bf16 %v2073_v39  ;;  %v2074_v56 = vunpack.i.l.bf16 %v2073_v39 }
 0x158   :  { %v2410_v45 = vpop.permute.xlu0 %2077  ;;  %v2088_v46 = vpop.permute.xlu1 %2087 }
 0x159   :  { %v2090_v49 = vunpack.i.h.bf16 %v2088_v46  ;;  %v2089_v50 = vunpack.i.l.bf16 %v2088_v46  ;;  %v2080_v17 = vunpack.i.h.bf16 %v2410_v45  ;;  %v2079_v22 = vunpack.i.l.bf16 %v2410_v45  ;;  %v343_v46 = vld [vmem:[%s2880_s3] sm:$0xff] }
 0x15b   :  { %v290_v52 = vsel %vm285_vm2, %v2069_v48, %v2089_v50  ;;  %v291_v53 = vsel %vm285_vm2, %v2070_v47, %v2090_v49  ;;  %v289_v62 = vsel %vm285_vm2, %v2090_v49, %v2075_v55  ;;  %v288_v63 = vsel %vm285_vm2, %v2089_v50, %v2074_v56  ;;  %v346_v49 = vld [vmem:[%s2880_s3 + $0x18] sm:$0xff] }
 0x15c   :  { %v2093_v57 = vpop.permute.xlu1 %2092  ;;  %v1949_v58 = vpack.c.bf16 %v291_v53, %v290_v52  ;;  %v2083_v0 = vpop.permute.xlu0 %2082  ;;  %v1965_v15 = vpack.c.bf16 %v289_v62, %v288_v63 }
 0x15d   :  { %v2095_v60 = vunpack.i.h.bf16 %v2093_v57  ;;  %v2094_v61 = vunpack.i.l.bf16 %v2093_v57  ;;  %v2085_v11 = vunpack.i.h.bf16 %v2083_v0  ;;  %v2084_v12 = vunpack.i.l.bf16 %v2083_v0 }
 0x15e   :  { %1950 = vmatprep.subr.bf16.mxu0 %v1949_v58 }
 0x15f   :  { %v292_v3 = vsel %vm285_vm2, %v2094_v61, %v2069_v48  ;;  %v293_v4 = vsel %vm285_vm2, %v2095_v60, %v2070_v47  ;;  %v286_v5 = vsel %vm285_vm2, %v2074_v56, %v2094_v61  ;;  %v287_v6 = vsel %vm285_vm2, %v2075_v55, %v2095_v60  ;;  %v344_v47 = vld [vmem:[%s2880_s3 + $0x8] sm:$0xff]  ;;  %v345_v48 = vld [vmem:[%s2880_s3 + $0x10] sm:$0xff]  ;;  %vm2002_vm2 = vmpackc.low %vm820_vm0, %vm820_vm0 }
 0x160   :  { %v1951_v7 = vpack.c.bf16 %v293_v4, %v292_v3  ;;  %v2098_v8 = vpop.permute.xlu1 %2097  ;;  %v1963_v9 = vpack.c.bf16 %v287_v6, %v286_v5  ;;  %vm1382_vm0 = vcmp.lt.s32.totalorder %v2420_v54, 252 }
 0x161   :  { %v2100_v13 = vunpack.i.h.bf16 %v2098_v8  ;;  %v2099_v14 = vunpack.i.l.bf16 %v2098_v8 }
 0x162   :  { %1953 = vmatpush1.bf16.msk.msra.mxu0 %vm1952_vm6, %v1951_v7  ;;  %1964 = vmatprep.subr.bf16.mxu1 %v1963_v9 }
 0x163   :  { %v326_v23 = vsel %vm322_vm4, %v2100_v13, %v2085_v11  ;;  %v325_v25 = vsel %vm322_vm4, %v2099_v14, %v2084_v12  ;;  %1955 = vmatprep.subr.bf16.mxu0 %v1954_v1  ;;  %1967 = vmatpush1.bf16.msk.msra.mxu1 %vm1966_vm8, %v1965_v15  ;;  %v328_v32 = vsel %vm322_vm4, %v2080_v17, %v2100_v13  ;;  %vm1335_vm8 = vcmp.lt.s32.totalorder %v2403_v41, 4  ;;  %v1918_v41 = vld [vmem:[%s2880_s3 + $0x48] sm:$0xff] }
 0x164   :  { %v1958_v26 = vpack.c.bf16 %v326_v23, %v325_v25  ;;  %v2103_v29 = vpop.permute.xlu1 %2102  ;;  %v327_v33 = vsel %vm322_vm4, %v2079_v22, %v2099_v14  ;;  %1969 = vmatprep.subr.bf16.mxu1 %v1968_v16 }
 0x165   :  { %v2105_v34 = vunpack.i.h.bf16 %v2103_v29  ;;  %v2104_v35 = vunpack.i.l.bf16 %v2103_v29  ;;  %v1961_v42 = vpack.c.bf16 %v328_v32, %v327_v33 }
 0x166   :  { %1957 = vmatpush1.bf16.msra.mxu0 %v1956_v31 }
 0x167   :  { %v324_v37 = vsel %vm322_vm4, %v2085_v11, %v2105_v34  ;;  %v330_v38 = vsel %vm322_vm4, %v2105_v34, %v2080_v17  ;;  %v323_v39 = vsel %vm322_vm4, %v2084_v12, %v2104_v35  ;;  %v329_v40 = vsel %vm322_vm4, %v2104_v35, %v2079_v22  ;;  %1960 = vmatprep.subr.msk.bf16.mxu0 %vm1959_vm9, %v1958_v26 }
 0x168   :  { %v1972_v44 = vpack.c.bf16 %v330_v38, %v329_v40  ;;  %v1975_v45 = vpack.c.bf16 %v324_v37, %v323_v39  ;;  %1971 = vmatpush1.bf16.msra.mxu1 %v1970_v36  ;;  %vm856_vm4 = vcmp.lt.s32.totalorder %v2420_v54, 254  ;;  %vm1344_vm9 = vcmp.ge.s32.totalorder %v2407_v43, 4 }
 0x169   :  { %vm1995_vm6 = vmpackc.low %vm856_vm4, %vm856_vm4 }
 0x16a   :  { %1962 = vmatpush1.bf16.msra.mxu0 %v1961_v42  ;;  %1974 = vmatprep.subr.msk.bf16.mxu1 %vm1973_vm11, %v1972_v44  ;;  %vm2024_vm11 = vmpackc.low %vm1344_vm9, %vm1344_vm9 }
 0x16c   :  { %1976 = vmatpush1.bf16.msra.mxu1 %v1975_v45 }
 0x16d   :  { %1869 = vmatmul.mubr.msk.f32.vlgmr.msra.gmra.mrb[4].mxu0 %vm371_vm12, %v343_v46  ;;  %v364_v50 = vpop.permute.xlu0 %363 }
 0x16e   :  { %454 = vmatprep.mubr.f32.mxu0 %v2285_v2 }
 0x16f   :  { %1877 = vmatmul.mubr.msk.f32.vlgmr.msra.gmra.mrb[4].mxu1 %vm371_vm12, %v343_v46 }
 0x170   :  { %543 = vmatprep.mubr.f32.mxu1 %v2285_v2 }
 0x171   :  { %1870 = vmatmul.mubr.msk.f32.gmra.mrb[6].mxu0 %vm371_vm12, %v344_v47  ;;  %v354_v57 = vpop.permute.xlu0 %353 }
 0x172   :  { %460 = vmatprep.mubr.f32.mxu0 %v2285_v2 }
 0x173   :  { %1878 = vmatmul.mubr.msk.f32.gmra.mrb[6].mxu1 %vm371_vm12, %v344_v47 }
 0x174   :  { %549 = vmatprep.mubr.f32.mxu1 %v2285_v2 }
 0x175   :  { %1871 = vmatmul.mubr.msk.f32.gmra.mrb[8].mxu0 %vm371_vm12, %v345_v48  ;;  %v369_v1 = vpop.permute.xlu1 %368 }
 0x176   :  { %466 = vmatprep.mubr.f32.mxu0 %v2285_v2 }
 0x177   :  { %1879 = vmatmul.mubr.msk.f32.gmra.mrb[8].mxu1 %vm371_vm12, %v345_v48 }
 0x178   :  { %555 = vmatprep.mubr.f32.mxu1 %v2285_v2 }
 0x179   :  { %1872 = vmatmul.mubr.msk.f32.gmra.mrb[10].mxu0 %vm371_vm12, %v346_v49  ;;  %v359_v23 = vpop.permute.xlu1 %358 }
 0x17a   :  { %695 = vmatprep.mubr.f32.mxu0 %v2285_v2 }
 0x17b   :  { %1880 = vmatmul.mubr.msk.f32.gmra.mrb[10].mxu1 %vm371_vm12, %v346_v49 }
 0x17c   :  { %772 = vmatprep.mubr.f32.mxu1 %v2285_v2 }
 0x240   :  { %v450_v52 = vpop.f32.mrb[4].mxu0 }
 0x241   :  { %v452_v53 = vpop.f32.mrb[5].mxu0  ;;  %v451_v59 = vadd.f32 %v450_v52, %v354_v57 }
 0x242   :  { %v539_v55 = vpop.f32.mrb[4].mxu1  ;;  %v453_v61 = vadd.f32 %v452_v53, %v354_v57 }
 0x243   :  { %v541_v56 = vpop.f32.mrb[5].mxu1  ;;  %v540_v63 = vadd.f32 %v539_v55, %v354_v57  ;;  %2189 = vtanh.f32 %v451_v59 }
 0x244   :  { %v456_v58 = vpop.f32.mrb[6].mxu0  ;;  %v542_v3 = vadd.f32 %v541_v56, %v354_v57  ;;  %2191 = vtanh.f32 %v453_v61 }
 0x245   :  { %v458_v60 = vpop.f32.mrb[7].mxu0  ;;  %2193 = vtanh.f32 %v540_v63  ;;  %v457_v36 = vadd.f32 %v456_v58, %v359_v23 }
 0x246   :  { %v545_v62 = vpop.f32.mrb[6].mxu1  ;;  %2195 = vtanh.f32 %v542_v3  ;;  %v459_v38 = vadd.f32 %v458_v60, %v359_v23 }
 0x247   :  { %v547_v0 = vpop.f32.mrb[7].mxu1  ;;  %v546_v42 = vadd.f32 %v545_v62, %v359_v23 }
 0x248   :  { %v462_v4 = vpop.f32.mrb[8].mxu0  ;;  %v548_v45 = vadd.f32 %v547_v0, %v359_v23 }
 0x249   :  { %v463_v5 = vadd.f32 %v462_v4, %v364_v50  ;;  %v464_v6 = vpop.f32.mrb[9].mxu0 }
 0x24a   :  { %v465_v7 = vadd.f32 %v464_v6, %v364_v50  ;;  %v551_v8 = vpop.f32.mrb[8].mxu1 }
 0x24b   :  { %v570_v9 = vmul.f32 0.5, %v463_v5  ;;  %v552_v11 = vadd.f32 %v551_v8, %v364_v50  ;;  %v553_v12 = vpop.f32.mrb[9].mxu1 }
 0x24c   :  { %v571_v13 = vmul.f32 0.5, %v465_v7  ;;  %v554_v14 = vadd.f32 %v553_v12, %v364_v50  ;;  %v468_v15 = vpop.f32.mrb[10].mxu0 }
 0x24d   :  { %2197 = vtanh.f32 %v570_v9  ;;  %v572_v16 = vmul.f32 0.5, %v552_v11  ;;  %v469_v17 = vadd.f32 %v468_v15, %v369_v1  ;;  %v470_v22 = vpop.f32.mrb[11].mxu0  ;;  %v2190_v40 = vpop.eup %2189 }
 0x24e   :  { %2199 = vtanh.f32 %v571_v13  ;;  %v573_v25 = vmul.f32 0.5, %v554_v14  ;;  %v471_v26 = vadd.f32 %v470_v22, %v369_v1  ;;  %v557_v29 = vpop.f32.mrb[10].mxu1  ;;  %v2192_v44 = vpop.eup %2191 }
 0x24f   :  { %2201 = vtanh.f32 %v572_v16  ;;  %v574_v31 = vmul.f32 0.5, %v469_v17  ;;  %v558_v32 = vadd.f32 %v557_v29, %v369_v1  ;;  %v559_v33 = vpop.f32.mrb[11].mxu1  ;;  %v2194_v46 = vpop.eup %2193 }
 0x250   :  { %2203 = vtanh.f32 %v573_v25  ;;  %v575_v34 = vmul.f32 0.5, %v471_v26  ;;  %v560_v35 = vadd.f32 %v559_v33, %v369_v1  ;;  %v2196_v47 = vpop.eup %2195 }
 0x251   :  { %2205 = vtanh.f32 %v574_v31  ;;  %v576_v37 = vmul.f32 0.5, %v558_v32 }
 0x252   :  { %2207 = vtanh.f32 %v575_v34  ;;  %v577_v39 = vmul.f32 0.5, %v560_v35 }
 0x253   :  { %2209 = vtanh.f32 %v576_v37  ;;  %v611_v37 = vld [vmem:[%s2881_s5 + $0x8] sm:$0xff] }
 0x254   :  { %2211 = vtanh.f32 %v577_v39 }
 0x255   :  { %2213 = vtanh.f32 %v457_v36  ;;  %v610_v36 = vld [vmem:[%s2881_s5] sm:$0xff] }
 0x256   :  { %2215 = vtanh.f32 %v459_v38 }
 0x257   :  { %v2198_v48 = vpop.eup %2197  ;;  %2217 = vtanh.f32 %v546_v42  ;;  %v617_v42 = vpop.permute.xlu0 %616 }
 0x258   :  { %v2200_v49 = vpop.eup %2199  ;;  %v586_v50 = vadd.f32 1.0, %v2198_v48  ;;  %2219 = vtanh.f32 %v548_v45  ;;  %v622_v45 = vpop.permute.xlu1 %621 }
 0x259   :  { %v2202_v52 = vpop.eup %2201  ;;  %v587_v53 = vadd.f32 1.0, %v2200_v49 }
 0x25a   :  { %v2204_v55 = vpop.eup %2203  ;;  %v594_v56 = vmul.f32 0.5, %v586_v50  ;;  %v588_v57 = vadd.f32 1.0, %v2202_v52 }
 0x25b   :  { %v2206_v58 = vpop.eup %2205  ;;  %v595_v59 = vmul.f32 0.5, %v587_v53  ;;  %v589_v60 = vadd.f32 1.0, %v2204_v55 }
 0x25c   :  { %v2208_v61 = vpop.eup %2207  ;;  %v602_v62 = vmul.f32 %v2190_v40, %v594_v56  ;;  %v596_v63 = vmul.f32 0.5, %v588_v57  ;;  %v590_v0 = vadd.f32 1.0, %v2206_v58 }
 0x25d   :  { %v2210_v1 = vpop.eup %2209  ;;  %v597_v3 = vmul.f32 0.5, %v589_v60  ;;  %v591_v4 = vadd.f32 1.0, %v2208_v61  ;;  %v603_v5 = vmul.f32 %v2192_v44, %v595_v59 }
 0x25e   :  { %v2212_v6 = vpop.eup %2211  ;;  %v604_v7 = vmul.f32 %v2194_v46, %v596_v63  ;;  %v598_v8 = vmul.f32 0.5, %v590_v0  ;;  %v592_v9 = vadd.f32 1.0, %v2210_v1 }
 0x25f   :  { %v2214_v11 = vpop.eup %2213  ;;  %v599_v12 = vmul.f32 0.5, %v591_v4  ;;  %v593_v13 = vadd.f32 1.0, %v2212_v6  ;;  %v605_v14 = vmul.f32 %v2196_v47, %v597_v3  ;;  %v1892_v6 = vld [vmem:[%s2878_s4 + $0x38] sm:$0xff] }
 0x260   :  { %v2216_v15 = vpop.eup %2215  ;;  %v606_v16 = vmul.f32 %v2214_v11, %v598_v8  ;;  %v600_v17 = vmul.f32 0.5, %v592_v9  ;;  %v1890_v8 = vld [vmem:[%s2878_s4 + $0x28] sm:$0xff]  ;;  %v1911_v9 = vld [vmem:[%s2879_s6 + $0x10] sm:$0xff]  ;;  %v1912_v11 = vld [vmem:[%s2879_s6 + $0x18] sm:$0xff] }
 0x261   :  { %v2218_v22 = vpop.eup %2217  ;;  %v601_v23 = vmul.f32 0.5, %v593_v13  ;;  %v607_v25 = vmul.f32 %v2216_v15, %v599_v12 }
 0x262   :  { %v2220_v26 = vpop.eup %2219  ;;  %v608_v29 = vmul.f32 %v2218_v22, %v600_v17  ;;  %v1979_v31 = vpack.c.bf16 %v606_v16, %v602_v62 }
 0x263   :  { %v1977_v32 = vpack.c.bf16 %v607_v25, %v603_v5  ;;  %v609_v33 = vmul.f32 %v2220_v26, %v601_v23  ;;  %v1891_v5 = vld [vmem:[%s2878_s4 + $0x30] sm:$0xff] }
 0x264   :  { %v1983_v34 = vpack.c.bf16 %v608_v29, %v604_v7  ;;  %v1889_v7 = vld [vmem:[%s2878_s4 + $0x20] sm:$0xff] }
 0x265   :  { %1978 = vmatprep.subr.bf16.mxu0 %v1977_v32  ;;  %v1981_v35 = vpack.c.bf16 %v609_v33, %v605_v14 }
 0x266   :  { %1980 = vmatpush1.bf16.msra.mxu0 %v1979_v31 }
 0x267   :  { %1982 = vmatprep.subr.bf16.mxu1 %v1981_v35 }
 0x268   :  { %1984 = vmatpush1.bf16.msra.mxu1 %v1983_v34 }
 0x269   :  { %1881 = vmatmul.mubr.msk.f32.vlgmr.msra.gmra.mrb[12].mxu0 %vm624_vm13, %v610_v36 }
 0x26a   :  { %701 = vmatprep.mubr.f32.mxu0 %v2285_v2 }
 0x26b   :  { %1883 = vmatmul.mubr.msk.f32.vlgmr.msra.gmra.mrb[12].mxu1 %vm624_vm13, %v610_v36 }
 0x26c   :  { %778 = vmatprep.mubr.f32.mxu1 %v2285_v2 }
 0x26d   :  { %1882 = vmatmul.mubr.msk.f32.gmra.mrb[14].mxu0 %vm624_vm13, %v611_v37 }
 0x26e   :  { %973 = vmatprep.mubr.f32.mxu0 %v2285_v2 }
 0x26f   :  { %1884 = vmatmul.mubr.msk.f32.gmra.mrb[14].mxu1 %vm624_vm13, %v611_v37 }
 0x270   :  { %1062 = vmatprep.mubr.f32.mxu1 %v2285_v2 }
 0x33c   :  { %v697_v38 = vpop.f32.mrb[12].mxu0 }
 0x33d   :  { %v699_v39 = vpop.f32.mrb[13].mxu0  ;;  %v2515_v47 = vadd.f32 %v697_v38, %v617_v42 }
 0x33e   :  { %v774_v40 = vpop.f32.mrb[12].mxu1  ;;  %v2519_v50 = vadd.f32 %v699_v39, %v617_v42 }
 0x33f   :  { %v776_v44 = vpop.f32.mrb[13].mxu1  ;;  %v2521_v52 = vadd.f32 %v774_v40, %v617_v42 }
 0x340   :  { %v703_v46 = vpop.f32.mrb[14].mxu0  ;;  %v2525_v56 = vadd.f32 %v776_v44, %v617_v42 }
 0x341   :  { %v2517_v48 = vadd.f32 %v703_v46, %v622_v45  ;;  %v705_v49 = vpop.f32.mrb[15].mxu0 }
 0x342   :  { %v2523_v53 = vadd.f32 %v705_v49, %v622_v45  ;;  %v780_v55 = vpop.f32.mrb[14].mxu1 }
 0x343   :  { %v2527_v57 = vadd.f32 %v780_v55, %v622_v45  ;;  %v782_v58 = vpop.f32.mrb[15].mxu1  ;;  %v2107_v59 = vpack.i.bf16 %v2517_v48, %v2515_v47  ;;  %v1992_v0 = vpack.c.bf16 %v2517_v48, %v2515_v47 }
 0x344   :  { %v2531_v60 = vadd.f32 %v782_v58, %v622_v45  ;;  %v2127_v61 = vpack.i.bf16 %v2523_v53, %v2519_v50  ;;  %v1990_v62 = vpack.c.bf16 %v2523_v53, %v2519_v50 }
 0x345   :  { %2108 = vrot.lane.b32.xlu0 %v2107_v59, %s2289_s1  ;;  %v2112_v63 = vpack.i.bf16 %v2527_v57, %v2521_v52  ;;  %v2006_v4 = vpack.c.bf16 %v2527_v57, %v2521_v52 }
 0x346   :  { %2128 = vrot.lane.b32.xlu1 %v2127_v61, %s2289_s1  ;;  %v2132_v1 = vpack.i.bf16 %v2531_v60, %v2525_v56  ;;  %v2004_v3 = vpack.c.bf16 %v2531_v60, %v2525_v56 }
 0x349   :  { %2113 = vrot.lane.b32.xlu0 %v2112_v63, %s2289_s1 }
 0x34a   :  { %2133 = vrot.lane.b32.xlu1 %v2132_v1, %s2289_s1  ;;  %s2291_s1 = smov 4  }
 0x34d   :  { %2118 = vrot.lane.b32.xlu0 %v2107_v59, %s2290_s2 }
 0x34e   :  { %2138 = vrot.lane.b32.xlu1 %v2127_v61, %s2290_s2 }
 0x351   :  { %2123 = vrot.lane.b32.xlu0 %v2112_v63, %s2290_s2 }
 0x352   :  { %2143 = vrot.lane.b32.xlu1 %v2132_v1, %s2290_s2  ;;  %s2292_s2 = smov 124  }
 0x355   :  { %889 = vperm.xlu0 %2065, %v1891_v5  }
 0x356   :  { %894 = vperm.xlu1 %2106, %v1892_v6  }
 0x359   :  { %879 = vperm.xlu0 %2065, %v1889_v7  }
 0x35a   :  { %884 = vperm.xlu1 %2106, %v1890_v8  }
 0x35d   :  { %1143 = vperm.xlu0 %2065, %v1911_v9  }
 0x35e   :  { %1148 = vperm.xlu1 %2106, %v1912_v11  }
 0x3b7   :  { %v2109_v12 = vpop.permute.xlu0 %2108 }
 0x3b8   :  { %v2111_v13 = vunpack.i.h.bf16 %v2109_v12  ;;  %v2110_v14 = vunpack.i.l.bf16 %v2109_v12  ;;  %v2129_v15 = vpop.permute.xlu1 %2128 }
 0x3b9   :  { %v2131_v16 = vunpack.i.h.bf16 %v2129_v15  ;;  %v2130_v17 = vunpack.i.l.bf16 %v2129_v15 }
 0x3bb   :  { %v2114_v22 = vpop.permute.xlu0 %2113  ;;  %v814_v23 = vsel %vm809_vm14, %v2110_v14, %v2130_v17  ;;  %v815_v25 = vsel %vm809_vm14, %v2111_v13, %v2131_v16 }
 0x3bc   :  { %v2116_v26 = vunpack.i.h.bf16 %v2114_v22  ;;  %v2115_v29 = vunpack.i.l.bf16 %v2114_v22  ;;  %v2134_v31 = vpop.permute.xlu1 %2133  ;;  %v1985_v32 = vpack.c.bf16 %v815_v25, %v814_v23  ;;  %v1885_v23 = vld [vmem:[%s2880_s3 + $0x20] sm:$0xff]  ;;  %v1887_v25 = vld [vmem:[%s2880_s3 + $0x30] sm:$0xff] }
 0x3bd   :  { %v2136_v33 = vunpack.i.h.bf16 %v2134_v31  ;;  %v2135_v34 = vunpack.i.l.bf16 %v2134_v31 }
 0x3be   :  { %v813_v35 = vsel %vm809_vm14, %v2131_v16, %v2116_v26  ;;  %1986 = vmatprep.subr.bf16.mxu0 %v1985_v32  ;;  %v812_v36 = vsel %vm809_vm14, %v2130_v17, %v2115_v29 }
 0x3bf   :  { %v816_v37 = vsel %vm809_vm14, %v2135_v34, %v2110_v14  ;;  %v817_v38 = vsel %vm809_vm14, %v2136_v33, %v2111_v13  ;;  %v2119_v39 = vpop.permute.xlu0 %2118  ;;  %v810_v40 = vsel %vm809_vm14, %v2115_v29, %v2135_v34  ;;  %v811_v46 = vsel %vm809_vm14, %v2116_v26, %v2136_v33  ;;  %v1888_v26 = vld [vmem:[%s2880_s3 + $0x38] sm:$0xff]  ;;  %vm2038_vm14 = vmpackc.low %vm1346_vm10, %vm1346_vm10 }
 0x3c0   :  { %v1987_v42 = vpack.c.bf16 %v817_v38, %v816_v37  ;;  %v2121_v44 = vunpack.i.h.bf16 %v2119_v39  ;;  %v2139_v45 = vpop.permute.xlu1 %2138  ;;  %v2120_v49 = vunpack.i.l.bf16 %v2119_v39  ;;  %v1999_v59 = vpack.c.bf16 %v811_v46, %v810_v40 }
 0x3c1   :  { %v2141_v55 = vunpack.i.h.bf16 %v2139_v45  ;;  %v2140_v58 = vunpack.i.l.bf16 %v2139_v45  ;;  %v2001_v61 = vpack.c.bf16 %v813_v35, %v812_v36 }
 0x3c2   :  { %1989 = vmatpush1.bf16.msk.msra.mxu0 %vm1988_vm1, %v1987_v42  ;;  %2000 = vmatprep.subr.bf16.mxu1 %v1999_v59  ;;  %vm1384_vm1 = vcmp.lt.s32.totalorder %v2443_v10, 252  ;;  %v1919_v10 = vld [vmem:[%s2880_s3 + $0x50] sm:$0xff] }
 0x3c3   :  { %v2124_v63 = vpop.permute.xlu0 %2123  ;;  %1991 = vmatprep.subr.bf16.mxu0 %v1990_v62  ;;  %2003 = vmatpush1.bf16.msk.msra.mxu1 %vm2002_vm2, %v2001_v61  ;;  %v851_v7 = vsel %vm846_vm3, %v2120_v49, %v2140_v58  ;;  %v852_v8 = vsel %vm846_vm3, %v2121_v44, %v2141_v55  ;;  %vm2031_vm2 = vmpackc.low %vm1382_vm0, %vm1382_vm0 }
 0x3c4   :  { %v2126_v1 = vunpack.i.h.bf16 %v2124_v63  ;;  %v2125_v5 = vunpack.i.l.bf16 %v2124_v63  ;;  %v2144_v6 = vpop.permute.xlu1 %2143  ;;  %2005 = vmatprep.subr.bf16.mxu1 %v2004_v3  ;;  %v1997_v16 = vpack.c.bf16 %v852_v8, %v851_v7 }
 0x3c5   :  { %v2146_v9 = vunpack.i.h.bf16 %v2144_v6  ;;  %v2145_v11 = vunpack.i.l.bf16 %v2144_v6 }
 0x3c6   :  { %v850_v62 = vsel %vm846_vm3, %v2141_v55, %v2126_v1  ;;  %v849_v12 = vsel %vm846_vm3, %v2140_v58, %v2125_v5  ;;  %1993 = vmatpush1.bf16.msra.mxu0 %v1992_v0 }
 0x3c7   :  { %v1994_v13 = vpack.c.bf16 %v850_v62, %v849_v12  ;;  %v847_v14 = vsel %vm846_vm3, %v2125_v5, %v2145_v11  ;;  %v848_v15 = vsel %vm846_vm3, %v2126_v1, %v2146_v9  ;;  %v853_v3 = vsel %vm846_vm3, %v2145_v11, %v2120_v49  ;;  %2007 = vmatpush1.bf16.msra.mxu1 %v2006_v4  ;;  %v1886_v4 = vld [vmem:[%s2880_s3 + $0x28] sm:$0xff] }
 0x3c8   :  { %v854_v17 = vsel %vm846_vm3, %v2146_v9, %v2121_v44  ;;  %v2011_v22 = vpack.c.bf16 %v848_v15, %v847_v14  ;;  %vm2045_vm3 = vmpackc.low %vm1384_vm1, %vm1384_vm1 }
 0x3c9   :  { %v2008_v0 = vpack.c.bf16 %v854_v17, %v853_v3  ;;  %1996 = vmatprep.subr.msk.bf16.mxu0 %vm1995_vm6, %v1994_v13 }
 0x3ca   :  { %1998 = vmatpush1.bf16.msra.mxu0 %v1997_v16 }
 0x3cb   :  { %2010 = vmatprep.subr.msk.bf16.mxu1 %vm2009_vm7, %v2008_v0 }
 0x3cc   :  { %2012 = vmatpush1.bf16.msra.mxu1 %v2011_v22 }
 0x3cd   :  { %1897 = vmatmul.mubr.msk.f32.vlgmr.msra.gmra.mrb[16].mxu0 %vm371_vm12, %v1885_v23 }
 0x3ce   :  { %979 = vmatprep.mubr.f32.mxu0 %v2285_v2 }
 0x3cf   :  { %1905 = vmatmul.mubr.msk.f32.vlgmr.msra.gmra.mrb[16].mxu1 %vm371_vm12, %v1885_v23 }
 0x3d0   :  { %1068 = vmatprep.mubr.f32.mxu1 %v2285_v2 }
 0x3d1   :  { %1898 = vmatmul.mubr.msk.f32.gmra.mrb[18].mxu0 %vm371_vm12, %v1886_v4 }
 0x3d2   :  { %985 = vmatprep.mubr.f32.mxu0 %v2285_v2 }
 0x3d3   :  { %1906 = vmatmul.mubr.msk.f32.gmra.mrb[18].mxu1 %vm371_vm12, %v1886_v4 }
 0x3d4   :  { %1074 = vmatprep.mubr.f32.mxu1 %v2285_v2  ;;  %v890_v29 = vpop.permute.xlu0 %889 }
 0x3d5   :  { %1899 = vmatmul.mubr.msk.f32.gmra.mrb[20].mxu0 %vm371_vm12, %v1887_v25  ;;  %v895_v58 = vpop.permute.xlu1 %894 }
 0x3d6   :  { %991 = vmatprep.mubr.f32.mxu0 %v2285_v2 }
 0x3d7   :  { %1907 = vmatmul.mubr.msk.f32.gmra.mrb[20].mxu1 %vm371_vm12, %v1887_v25 }
 0x3d8   :  { %1080 = vmatprep.mubr.f32.mxu1 %v2285_v2  ;;  %v880_v35 = vpop.permute.xlu0 %879 }
 0x3d9   :  { %1900 = vmatmul.mubr.msk.f32.gmra.mrb[22].mxu0 %vm371_vm12, %v1888_v26  ;;  %v885_v17 = vpop.permute.xlu1 %884 }
 0x3da   :  { %1221 = vmatprep.mubr.f32.mxu0 %v2285_v2 }
 0x3db   :  { %1908 = vmatmul.mubr.msk.f32.gmra.mrb[22].mxu1 %vm371_vm12, %v1888_v26 }
 0x3dc   :  { %1298 = vmatprep.mubr.f32.mxu1 %v2285_v2 }
 0x4a0   :  { %v975_v31 = vpop.f32.mrb[16].mxu0 }
 0x4a1   :  { %v977_v32 = vpop.f32.mrb[17].mxu0  ;;  %v976_v37 = vadd.f32 %v975_v31, %v880_v35 }
 0x4a2   :  { %v1064_v33 = vpop.f32.mrb[16].mxu1  ;;  %v978_v39 = vadd.f32 %v977_v32, %v880_v35 }
 0x4a3   :  { %v1066_v34 = vpop.f32.mrb[17].mxu1  ;;  %v1065_v42 = vadd.f32 %v1064_v33, %v880_v35  ;;  %2221 = vtanh.f32 %v976_v37 }
 0x4a4   :  { %v981_v36 = vpop.f32.mrb[18].mxu0  ;;  %v1067_v45 = vadd.f32 %v1066_v34, %v880_v35  ;;  %2223 = vtanh.f32 %v978_v39 }
 0x4a5   :  { %v983_v38 = vpop.f32.mrb[19].mxu0  ;;  %2225 = vtanh.f32 %v1065_v42  ;;  %v982_v23 = vadd.f32 %v981_v36, %v885_v17 }
 0x4a6   :  { %v1070_v40 = vpop.f32.mrb[18].mxu1  ;;  %2227 = vtanh.f32 %v1067_v45  ;;  %v984_v25 = vadd.f32 %v983_v38, %v885_v17 }
 0x4a7   :  { %v1072_v44 = vpop.f32.mrb[19].mxu1  ;;  %v1071_v31 = vadd.f32 %v1070_v40, %v885_v17 }
 0x4a8   :  { %v987_v46 = vpop.f32.mrb[20].mxu0  ;;  %v1073_v33 = vadd.f32 %v1072_v44, %v885_v17 }
 0x4a9   :  { %v988_v49 = vadd.f32 %v987_v46, %v890_v29  ;;  %v989_v55 = vpop.f32.mrb[21].mxu0 }
 0x4aa   :  { %v990_v59 = vadd.f32 %v989_v55, %v890_v29  ;;  %v1076_v61 = vpop.f32.mrb[20].mxu1 }
 0x4ab   :  { %v1095_v63 = vmul.f32 0.5, %v988_v49  ;;  %v1077_v1 = vadd.f32 %v1076_v61, %v890_v29  ;;  %v1078_v5 = vpop.f32.mrb[21].mxu1 }
 0x4ac   :  { %v1096_v6 = vmul.f32 0.5, %v990_v59  ;;  %v1079_v7 = vadd.f32 %v1078_v5, %v890_v29  ;;  %v993_v8 = vpop.f32.mrb[22].mxu0 }
 0x4ad   :  { %2229 = vtanh.f32 %v1095_v63  ;;  %v1097_v9 = vmul.f32 0.5, %v1077_v1  ;;  %v994_v11 = vadd.f32 %v993_v8, %v895_v58  ;;  %v995_v62 = vpop.f32.mrb[23].mxu0  ;;  %v2222_v29 = vpop.eup %2221 }
 0x4ae   :  { %2231 = vtanh.f32 %v1096_v6  ;;  %v1098_v12 = vmul.f32 0.5, %v1079_v7  ;;  %v996_v13 = vadd.f32 %v995_v62, %v895_v58  ;;  %v1082_v14 = vpop.f32.mrb[22].mxu1  ;;  %v2224_v32 = vpop.eup %2223 }
 0x4af   :  { %2233 = vtanh.f32 %v1097_v9  ;;  %v1099_v15 = vmul.f32 0.5, %v994_v11  ;;  %v1083_v3 = vadd.f32 %v1082_v14, %v895_v58  ;;  %v1084_v16 = vpop.f32.mrb[23].mxu1  ;;  %v2226_v34 = vpop.eup %2225 }
 0x4b0   :  { %2235 = vtanh.f32 %v1098_v12  ;;  %v1100_v22 = vmul.f32 0.5, %v996_v13  ;;  %v1085_v0 = vadd.f32 %v1084_v16, %v895_v58  ;;  %v2228_v35 = vpop.eup %2227 }
 0x4b1   :  { %2237 = vtanh.f32 %v1099_v15  ;;  %v1101_v4 = vmul.f32 0.5, %v1083_v3 }
 0x4b2   :  { %2239 = vtanh.f32 %v1100_v22  ;;  %v1102_v26 = vmul.f32 0.5, %v1085_v0 }
 0x4b3   :  { %2241 = vtanh.f32 %v1101_v4 }
 0x4b4   :  { %2243 = vtanh.f32 %v1102_v26 }
 0x4b5   :  { %2245 = vtanh.f32 %v982_v23 }
 0x4b6   :  { %2247 = vtanh.f32 %v984_v25 }
 0x4b7   :  { %v2230_v37 = vpop.eup %2229  ;;  %2249 = vtanh.f32 %v1071_v31 }
 0x4b8   :  { %v2232_v39 = vpop.eup %2231  ;;  %2251 = vtanh.f32 %v1073_v33  ;;  %v1111_v36 = vadd.f32 1.0, %v2230_v37  ;;  %v1144_v37 = vpop.permute.xlu0 %1143 }
 0x4b9   :  { %v2234_v42 = vpop.eup %2233  ;;  %v1112_v45 = vadd.f32 1.0, %v2232_v39 }
 0x4ba   :  { %v2236_v38 = vpop.eup %2235  ;;  %v1119_v46 = vmul.f32 0.5, %v1111_v36  ;;  %v1113_v49 = vadd.f32 1.0, %v2234_v42 }
 0x4bb   :  { %v2238_v55 = vpop.eup %2237  ;;  %v1120_v40 = vmul.f32 0.5, %v1112_v45  ;;  %v1114_v58 = vadd.f32 1.0, %v2236_v38  ;;  %v785_v45 = vadd.f32 %v2515_v47, %v2361_v18  ;;  %v788_v47 = vadd.f32 %v2525_v56, %v2381_v30 }
 0x4bc   :  { %v2240_v59 = vpop.eup %2239  ;;  %v1127_v44 = vmul.f32 %v2222_v29, %v1119_v46  ;;  %v1121_v61 = vmul.f32 0.5, %v1113_v49  ;;  %v1115_v63 = vadd.f32 1.0, %v2238_v55  ;;  %v786_v49 = vadd.f32 %v2519_v50, %v2375_v27 }
 0x4bd   :  { %v2242_v1 = vpop.eup %2241  ;;  %v1122_v5 = vmul.f32 0.5, %v1114_v58  ;;  %v1116_v6 = vadd.f32 1.0, %v2240_v59  ;;  %v1128_v7 = vmul.f32 %v2224_v32, %v1120_v40  ;;  %v787_v59 = vadd.f32 %v2521_v52, %v2363_v19 }
 0x4be   :  { %v2244_v8 = vpop.eup %2243  ;;  %v1129_v9 = vmul.f32 %v2226_v34, %v1121_v61  ;;  %v1123_v11 = vmul.f32 0.5, %v1115_v63  ;;  %v1117_v62 = vadd.f32 1.0, %v2242_v1  ;;  %v1909_v34 = vld [vmem:[%s2881_s5 + $0x10] sm:$0xff]  ;;  %v789_v52 = vadd.f32 %v2517_v48, %v2365_v20 }
 0x4bf   :  { %v2246_v12 = vpop.eup %2245  ;;  %v1124_v13 = vmul.f32 0.5, %v1116_v6  ;;  %v1118_v14 = vadd.f32 1.0, %v2244_v8  ;;  %v1130_v15 = vmul.f32 %v2228_v35, %v1122_v5  ;;  %v1910_v35 = vld [vmem:[%s2881_s5 + $0x18] sm:$0xff] }
 0x4c0   :  { %v2248_v3 = vpop.eup %2247  ;;  %v1131_v16 = vmul.f32 %v2246_v12, %v1123_v11  ;;  %v1125_v17 = vmul.f32 0.5, %v1117_v62 }
 0x4c1   :  { %v2250_v22 = vpop.eup %2249  ;;  %v1126_v0 = vmul.f32 0.5, %v1118_v14  ;;  %v1132_v23 = vmul.f32 %v2248_v3, %v1124_v13  ;;  %v1924_v3 = vld [vmem:[%s2878_s4 + $0x58] sm:$0xff] }
 0x4c2   :  { %v2252_v4 = vpop.eup %2251  ;;  %v1133_v25 = vmul.f32 %v2250_v22, %v1125_v17  ;;  %v2015_v26 = vpack.c.bf16 %v1131_v16, %v1127_v44  ;;  %v1149_v44 = vpop.permute.xlu1 %1148  ;;  %v1921_v16 = vld [vmem:[%s2878_s4 + $0x40] sm:$0xff]  ;;  %v1922_v17 = vld [vmem:[%s2878_s4 + $0x48] sm:$0xff] }
 0x4c3   :  { %v2013_v29 = vpack.c.bf16 %v1132_v23, %v1128_v7  ;;  %v1134_v31 = vmul.f32 %v2252_v4, %v1126_v0  ;;  %v790_v7 = vadd.f32 %v2523_v53, %v2369_v24  ;;  %v792_v53 = vadd.f32 %v2531_v60, %v2377_v28  ;;  %v1923_v60 = vld [vmem:[%s2878_s4 + $0x50] sm:$0xff]  ;;  %v1943_v22 = vld [vmem:[%s2879_s6 + $0x20] sm:$0xff]  ;;  %v1944_v0 = vld [vmem:[%s2879_s6 + $0x28] sm:$0xff] }
 0x4c4   :  { %v2019_v32 = vpack.c.bf16 %v1133_v25, %v1129_v9  ;;  %v791_v9 = vadd.f32 %v2527_v57, %v2367_v21 }
 0x4c5   :  { %2014 = vmatprep.subr.bf16.mxu0 %v2013_v29  ;;  %v2017_v33 = vpack.c.bf16 %v1134_v31, %v1130_v15 }
 0x4c6   :  { %2016 = vmatpush1.bf16.msra.mxu0 %v2015_v26 }
 0x4c7   :  { %2018 = vmatprep.subr.bf16.mxu1 %v2017_v33 }
 0x4c8   :  { %2020 = vmatpush1.bf16.msra.mxu1 %v2019_v32 }
 0x4c9   :  { %1913 = vmatmul.mubr.msk.f32.vlgmr.msra.gmra.mrb[24].mxu0 %vm624_vm13, %v1909_v34 }
 0x4ca   :  { %1227 = vmatprep.mubr.f32.mxu0 %v2285_v2 }
 0x4cb   :  { %1915 = vmatmul.mubr.msk.f32.vlgmr.msra.gmra.mrb[24].mxu1 %vm624_vm13, %v1909_v34 }
 0x4cc   :  { %1304 = vmatprep.mubr.f32.mxu1 %v2285_v2 }
 0x4cd   :  { %1914 = vmatmul.mubr.msk.f32.gmra.mrb[26].mxu0 %vm624_vm13, %v1910_v35 }
 0x4ce   :  { %1499 = vmatprep.mubr.f32.mxu0 %v2285_v2 }
 0x4cf   :  { %1916 = vmatmul.mubr.msk.f32.gmra.mrb[26].mxu1 %vm624_vm13, %v1910_v35 }
 0x4d0   :  { %1588 = vmatprep.mubr.f32.mxu1 %v2285_v2 }
 0x59c   :  { %v1223_v39 = vpop.f32.mrb[24].mxu0 }
 0x59d   :  { %v2660_v36 = vadd.f32 %v1223_v39, %v1144_v37  ;;  %v1225_v42 = vpop.f32.mrb[25].mxu0 }
 0x59e   :  { %v2664_v38 = vadd.f32 %v1225_v42, %v1144_v37  ;;  %v1300_v46 = vpop.f32.mrb[24].mxu1 }
 0x59f   :  { %v2668_v55 = vadd.f32 %v1300_v46, %v1144_v37  ;;  %v1302_v40 = vpop.f32.mrb[25].mxu1  ;;  %v2671_v58 = vadd.f32 %v2660_v36, %v785_v45 }
 0x5a0   :  { %v2675_v61 = vadd.f32 %v1302_v40, %v1144_v37  ;;  %v1229_v63 = vpop.f32.mrb[26].mxu0  ;;  %v2678_v18 = vadd.f32 %v2664_v38, %v786_v49 }
 0x5a1   :  { %v2682_v27 = vadd.f32 %v1229_v63, %v1149_v44  ;;  %v1231_v50 = vpop.f32.mrb[27].mxu0  ;;  %v2685_v1 = vadd.f32 %v2668_v55, %v787_v59 }
 0x5a2   :  { %v2687_v5 = vadd.f32 %v1231_v50, %v1149_v44  ;;  %v1306_v6 = vpop.f32.mrb[26].mxu1  ;;  %v2690_v19 = vadd.f32 %v2675_v61, %v788_v47 }
 0x5a3   :  { %v2696_v8 = vadd.f32 %v1306_v6, %v1149_v44  ;;  %v1308_v30 = vpop.f32.mrb[27].mxu1  ;;  %v2147_v56 = vpack.i.bf16 %v2682_v27, %v2660_v36  ;;  %v2028_v48 = vpack.c.bf16 %v2682_v27, %v2660_v36  ;;  %v2721_v13 = vadd.f32 %v2682_v27, %v789_v52  ;;  %v1917_v27 = vld [vmem:[%s2880_s3 + $0x40] sm:$0xff] }
 0x5a4   :  { %v2702_v11 = vadd.f32 %v1308_v30, %v1149_v44  ;;  %v2167_v62 = vpack.i.bf16 %v2687_v5, %v2664_v38  ;;  %v2026_v20 = vpack.c.bf16 %v2687_v5, %v2664_v38  ;;  %v2724_v14 = vadd.f32 %v2687_v5, %v790_v7 }
 0x5a5   :  { %2148 = vrot.lane.b32.xlu0 %v2147_v56, %s2291_s1  ;;  %v2152_v24 = vpack.i.bf16 %v2696_v8, %v2668_v55  ;;  %v2042_v12 = vpack.c.bf16 %v2696_v8, %v2668_v55  ;;  %v2727_v15 = vadd.f32 %v2696_v8, %v791_v9  ;;  %v1920_v55 = vld [vmem:[%s2880_s3 + $0x58] sm:$0xff] }
 0x5a6   :  { %2168 = vrot.lane.b32.xlu1 %v2167_v62, %s2291_s1  ;;  %v2172_v21 = vpack.i.bf16 %v2702_v11, %v2675_v61  ;;  %v2040_v57 = vpack.c.bf16 %v2702_v11, %v2675_v61  ;;  %v2730_v28 = vadd.f32 %v2702_v11, %v792_v53 }
 0x5a9   :  { %2153 = vrot.lane.b32.xlu0 %v2152_v24, %s2291_s1 }
 0x5aa   :  { %2173 = vrot.lane.b32.xlu1 %v2172_v21, %s2291_s1 }
 0x5ad   :  { %2158 = vrot.lane.b32.xlu0 %v2147_v56, %s2292_s2 }
 0x5ae   :  { %2178 = vrot.lane.b32.xlu1 %v2167_v62, %s2292_s2 }
 0x5b1   :  { %2163 = vrot.lane.b32.xlu0 %v2152_v24, %s2292_s2 }
 0x5b2   :  { %2183 = vrot.lane.b32.xlu1 %v2172_v21, %s2292_s2 }
 0x5b5   :  { %1415 = vperm.xlu0 %2065, %v1923_v60  }
 0x5b6   :  { %1420 = vperm.xlu1 %2106, %v1924_v3  }
 0x5b9   :  { %1405 = vperm.xlu0 %2065, %v1921_v16  }
 0x5ba   :  { %1410 = vperm.xlu1 %2106, %v1922_v17  }
 0x5bd   :  { %1669 = vperm.xlu0 %2065, %v1943_v22  }
 0x5be   :  { %1674 = vperm.xlu1 %2106, %v1944_v0  }
 0x617   :  { %v2149_v23 = vpop.permute.xlu0 %2148 }
 0x618   :  { %v2151_v4 = vunpack.i.h.bf16 %v2149_v23  ;;  %v2150_v25 = vunpack.i.l.bf16 %v2149_v23  ;;  %v2169_v26 = vpop.permute.xlu1 %2168 }
 0x619   :  { %v2171_v29 = vunpack.i.h.bf16 %v2169_v26  ;;  %v2170_v31 = vunpack.i.l.bf16 %v2169_v26 }
 0x61b   :  { %v2154_v32 = vpop.permute.xlu0 %2153  ;;  %v1340_v33 = vsel %vm1335_vm8, %v2150_v25, %v2170_v31  ;;  %v1341_v34 = vsel %vm1335_vm8, %v2151_v4, %v2171_v29 }
 0x61c   :  { %v2156_v35 = vunpack.i.h.bf16 %v2154_v32  ;;  %v2155_v37 = vunpack.i.l.bf16 %v2154_v32  ;;  %v2174_v39 = vpop.permute.xlu1 %2173  ;;  %v2021_v42 = vpack.c.bf16 %v1341_v34, %v1340_v33 }
 0x61d   :  { %v2176_v45 = vunpack.i.h.bf16 %v2174_v39  ;;  %v2175_v46 = vunpack.i.l.bf16 %v2174_v39 }
 0x61e   :  { %v1339_v49 = vsel %vm1335_vm8, %v2171_v29, %v2156_v35  ;;  %2022 = vmatprep.subr.bf16.mxu0 %v2021_v42  ;;  %v1338_v40 = vsel %vm1335_vm8, %v2170_v31, %v2155_v37 }
 0x61f   :  { %v1342_v59 = vsel %vm1335_vm8, %v2175_v46, %v2150_v25  ;;  %v1343_v44 = vsel %vm1335_vm8, %v2176_v45, %v2151_v4  ;;  %v2159_v63 = vpop.permute.xlu0 %2158  ;;  %v1336_v43 = vsel %vm1335_vm8, %v2155_v37, %v2175_v46  ;;  %v1337_v51 = vsel %vm1335_vm8, %v2156_v35, %v2176_v45 }
 0x620   :  { %v2023_v47 = vpack.c.bf16 %v1343_v44, %v1342_v59  ;;  %v2161_v50 = vunpack.i.h.bf16 %v2159_v63  ;;  %v2179_v6 = vpop.permute.xlu1 %2178  ;;  %v2160_v52 = vunpack.i.l.bf16 %v2159_v63  ;;  %v2035_v56 = vpack.c.bf16 %v1337_v51, %v1336_v43 }
 0x621   :  { %v2181_v7 = vunpack.i.h.bf16 %v2179_v6  ;;  %v2180_v30 = vunpack.i.l.bf16 %v2179_v6  ;;  %v2037_v9 = vpack.c.bf16 %v1339_v49, %v1338_v40 }
 0x622   :  { %2025 = vmatpush1.bf16.msk.msra.mxu0 %vm2024_vm11, %v2023_v47  ;;  %2036 = vmatprep.subr.bf16.mxu1 %v2035_v56 }
 0x623   :  { %v2164_v62 = vpop.permute.xlu0 %2163  ;;  %2027 = vmatprep.subr.bf16.mxu0 %v2026_v20  ;;  %2039 = vmatpush1.bf16.msk.msra.mxu1 %vm2038_vm14, %v2037_v9  ;;  %v1377_v60 = vsel %vm1372_vm15, %v2160_v52, %v2180_v30  ;;  %v1378_v3 = vsel %vm1372_vm15, %v2161_v50, %v2181_v7 }
 0x624   :  { %v2166_v24 = vunpack.i.h.bf16 %v2164_v62  ;;  %v2165_v53 = vunpack.i.l.bf16 %v2164_v62  ;;  %v2184_v21 = vpop.permute.xlu1 %2183  ;;  %2041 = vmatprep.subr.bf16.mxu1 %v2040_v57  ;;  %v2033_v11 = vpack.c.bf16 %v1378_v3, %v1377_v60 }
 0x625   :  { %v2186_v16 = vunpack.i.h.bf16 %v2184_v21  ;;  %v2185_v17 = vunpack.i.l.bf16 %v2184_v21 }
 0x626   :  { %v1376_v54 = vsel %vm1372_vm15, %v2181_v7, %v2166_v24  ;;  %v1375_v38 = vsel %vm1372_vm15, %v2180_v30, %v2165_v53  ;;  %2029 = vmatpush1.bf16.msra.mxu0 %v2028_v48 }
 0x627   :  { %v2030_v5 = vpack.c.bf16 %v1376_v54, %v1375_v38  ;;  %v1373_v20 = vsel %vm1372_vm15, %v2165_v53, %v2185_v17  ;;  %v1374_v22 = vsel %vm1372_vm15, %v2166_v24, %v2186_v16  ;;  %v1379_v61 = vsel %vm1372_vm15, %v2185_v17, %v2160_v52  ;;  %2043 = vmatpush1.bf16.msra.mxu1 %v2042_v12 }
 0x628   :  { %v1380_v57 = vsel %vm1372_vm15, %v2186_v16, %v2161_v50  ;;  %v2047_v0 = vpack.c.bf16 %v1374_v22, %v1373_v20 }
 0x629   :  { %v2044_v36 = vpack.c.bf16 %v1380_v57, %v1379_v61  ;;  %2032 = vmatprep.subr.msk.bf16.mxu0 %vm2031_vm2, %v2030_v5 }
 0x62a   :  { %2034 = vmatpush1.bf16.msra.mxu0 %v2033_v11 }
 0x62b   :  { %2046 = vmatprep.subr.msk.bf16.mxu1 %vm2045_vm3, %v2044_v36 }
 0x62c   :  { %2048 = vmatpush1.bf16.msra.mxu1 %v2047_v0 }
 0x62d   :  { %1929 = vmatmul.mubr.msk.f32.vlgmr.msra.gmra.mrb[28].mxu0 %vm371_vm12, %v1917_v27 }
 0x62e   :  { %1505 = vmatprep.mubr.f32.mxu0 %v2285_v2 }
 0x62f   :  { %1937 = vmatmul.mubr.msk.f32.vlgmr.msra.gmra.mrb[28].mxu1 %vm371_vm12, %v1917_v27 }
 0x630   :  { %1594 = vmatprep.mubr.f32.mxu1 %v2285_v2 }
 0x631   :  { %1930 = vmatmul.mubr.msk.f32.gmra.mrb[30].mxu0 %vm371_vm12, %v1918_v41 }
 0x632   :  { %1511 = vmatprep.mubr.f32.mxu0 %v2285_v2 }
 0x633   :  { %1938 = vmatmul.mubr.msk.f32.gmra.mrb[30].mxu1 %vm371_vm12, %v1918_v41 }
 0x634   :  { %1600 = vmatprep.mubr.f32.mxu1 %v2285_v2  ;;  %v1416_v8 = vpop.permute.xlu0 %1415 }
 0x635   :  { %1931 = vmatmul.mubr.msk.f32.gmra.mrb[32].mxu0 %vm371_vm12, %v1919_v10  ;;  %v1421_v46 = vpop.permute.xlu1 %1420 }
 0x636   :  { %1517 = vmatprep.mubr.f32.mxu0 %v2285_v2 }
 0x637   :  { %1939 = vmatmul.mubr.msk.f32.gmra.mrb[32].mxu1 %vm371_vm12, %v1919_v10 }
 0x638   :  { %1606 = vmatprep.mubr.f32.mxu1 %v2285_v2  ;;  %v1406_v25 = vpop.permute.xlu0 %1405 }
 0x639   :  { %1932 = vmatmul.mubr.msk.f32.gmra.mrb[34].mxu0 %vm371_vm12, %v1920_v55  ;;  %v1411_v53 = vpop.permute.xlu1 %1410 }
 0x63a   :  { %1747 = vmatprep.mubr.f32.mxu0 %v2285_v2 }
 0x63b   :  { %1940 = vmatmul.mubr.msk.f32.gmra.mrb[34].mxu1 %vm371_vm12, %v1920_v55 }
 0x63c   :  { %1824 = vmatprep.mubr.f32.mxu1 %v2285_v2 }
 0x700   :  { %v1501_v48 = vpop.f32.mrb[28].mxu0 }
 0x701   :  { %v1503_v12 = vpop.f32.mrb[29].mxu0  ;;  %v1502_v29 = vadd.f32 %v1501_v48, %v1406_v25 }
 0x702   :  { %v1590_v23 = vpop.f32.mrb[28].mxu1  ;;  %v1504_v32 = vadd.f32 %v1503_v12, %v1406_v25 }
 0x703   :  { %v1592_v4 = vpop.f32.mrb[29].mxu1  ;;  %v1591_v34 = vadd.f32 %v1590_v23, %v1406_v25  ;;  %2253 = vtanh.f32 %v1502_v29 }
 0x704   :  { %v1507_v26 = vpop.f32.mrb[30].mxu0  ;;  %v1593_v37 = vadd.f32 %v1592_v4, %v1406_v25  ;;  %2255 = vtanh.f32 %v1504_v32 }
 0x705   :  { %v1509_v31 = vpop.f32.mrb[31].mxu0  ;;  %2257 = vtanh.f32 %v1591_v34  ;;  %v1508_v3 = vadd.f32 %v1507_v26, %v1411_v53 }
 0x706   :  { %v1596_v33 = vpop.f32.mrb[30].mxu1  ;;  %2259 = vtanh.f32 %v1593_v37  ;;  %v1510_v17 = vadd.f32 %v1509_v31, %v1411_v53 }
 0x707   :  { %v1598_v35 = vpop.f32.mrb[31].mxu1  ;;  %v1597_v5 = vadd.f32 %v1596_v33, %v1411_v53 }
 0x708   :  { %v1513_v39 = vpop.f32.mrb[32].mxu0  ;;  %v1599_v22 = vadd.f32 %v1598_v35, %v1411_v53  ;;  %v1670_v53 = vpop.permute.xlu0 %1669 }
 0x709   :  { %v1514_v42 = vadd.f32 %v1513_v39, %v1416_v8  ;;  %v1515_v45 = vpop.f32.mrb[33].mxu0 }
 0x70a   :  { %v1516_v49 = vadd.f32 %v1515_v45, %v1416_v8  ;;  %v1602_v40 = vpop.f32.mrb[32].mxu1 }
 0x70b   :  { %v1621_v59 = vmul.f32 0.5, %v1514_v42  ;;  %v1603_v44 = vadd.f32 %v1602_v40, %v1416_v8  ;;  %v1604_v63 = vpop.f32.mrb[33].mxu1 }
 0x70c   :  { %v1622_v43 = vmul.f32 0.5, %v1516_v49  ;;  %v1605_v47 = vadd.f32 %v1604_v63, %v1416_v8  ;;  %v1519_v50 = vpop.f32.mrb[34].mxu0 }
 0x70d   :  { %2261 = vtanh.f32 %v1621_v59  ;;  %v1623_v6 = vmul.f32 0.5, %v1603_v44  ;;  %v1520_v51 = vadd.f32 %v1519_v50, %v1421_v46  ;;  %v1521_v52 = vpop.f32.mrb[35].mxu0  ;;  %v2254_v38 = vpop.eup %2253 }
 0x70e   :  { %2263 = vtanh.f32 %v1622_v43  ;;  %v1624_v7 = vmul.f32 0.5, %v1605_v47  ;;  %v1522_v30 = vadd.f32 %v1521_v52, %v1421_v46  ;;  %v1608_v56 = vpop.f32.mrb[34].mxu1  ;;  %v2256_v20 = vpop.eup %2255 }
 0x70f   :  { %2265 = vtanh.f32 %v1623_v6  ;;  %v1625_v9 = vmul.f32 0.5, %v1520_v51  ;;  %v1609_v62 = vadd.f32 %v1608_v56, %v1421_v46  ;;  %v1610_v24 = vpop.f32.mrb[35].mxu1  ;;  %v2258_v61 = vpop.eup %2257 }
 0x710   :  { %2267 = vtanh.f32 %v1624_v7  ;;  %v1626_v21 = vmul.f32 0.5, %v1522_v30  ;;  %v1611_v60 = vadd.f32 %v1610_v24, %v1421_v46  ;;  %v2260_v11 = vpop.eup %2259  ;;  %v1942_v24 = vld [vmem:[%s2881_s5 + $0x28] sm:$0xff] }
 0x711   :  { %2269 = vtanh.f32 %v1625_v9  ;;  %v1627_v16 = vmul.f32 0.5, %v1609_v62  ;;  %v1941_v62 = vld [vmem:[%s2881_s5 + $0x20] sm:$0xff] }
 0x712   :  { %2271 = vtanh.f32 %v1626_v21  ;;  %v1628_v54 = vmul.f32 0.5, %v1611_v60 }
 0x713   :  { %2273 = vtanh.f32 %v1627_v16 }
 0x714   :  { %2275 = vtanh.f32 %v1628_v54 }
 0x715   :  { %2277 = vtanh.f32 %v1508_v3 }
 0x716   :  { %2279 = vtanh.f32 %v1510_v17 }
 0x717   :  { %v2262_v57 = vpop.eup %2261  ;;  %2281 = vtanh.f32 %v1597_v5 }
 0x718   :  { %v2264_v0 = vpop.eup %2263  ;;  %2283 = vtanh.f32 %v1599_v22  ;;  %v1637_v36 = vadd.f32 1.0, %v2262_v57 }
 0x719   :  { %v2266_v27 = vpop.eup %2265  ;;  %v1638_v41 = vadd.f32 1.0, %v2264_v0 }
 0x71a   :  { %v2268_v10 = vpop.eup %2267  ;;  %v1645_v55 = vmul.f32 0.5, %v1637_v36  ;;  %v1639_v8 = vadd.f32 1.0, %v2266_v27 }
 0x71b   :  { %v2270_v48 = vpop.eup %2269  ;;  %v1646_v12 = vmul.f32 0.5, %v1638_v41  ;;  %v1640_v23 = vadd.f32 1.0, %v2268_v10 }
 0x71c   :  { %v2272_v4 = vpop.eup %2271  ;;  %v1653_v25 = vmul.f32 %v2254_v38, %v1645_v55  ;;  %v1647_v26 = vmul.f32 0.5, %v1639_v8  ;;  %v1641_v29 = vadd.f32 1.0, %v2270_v48 }
 0x71d   :  { %v2274_v31 = vpop.eup %2273  ;;  %v1648_v32 = vmul.f32 0.5, %v1640_v23  ;;  %v1642_v33 = vadd.f32 1.0, %v2272_v4  ;;  %v1654_v34 = vmul.f32 %v2256_v20, %v1646_v12  ;;  %v1675_v20 = vpop.permute.xlu1 %1674 }
 0x71e   :  { %v2276_v35 = vpop.eup %2275  ;;  %v1655_v37 = vmul.f32 %v2258_v61, %v1647_v26  ;;  %v1649_v39 = vmul.f32 0.5, %v1641_v29  ;;  %v1643_v42 = vadd.f32 1.0, %v2274_v31 }
 0x71f   :  { %v2278_v45 = vpop.eup %2277  ;;  %v1650_v46 = vmul.f32 0.5, %v1642_v33  ;;  %v1644_v49 = vadd.f32 1.0, %v2276_v35  ;;  %v1656_v40 = vmul.f32 %v2260_v11, %v1648_v32 }
 0x720   :  { %v2280_v59 = vpop.eup %2279  ;;  %v1657_v44 = vmul.f32 %v2278_v45, %v1649_v39  ;;  %v1651_v63 = vmul.f32 0.5, %v1643_v42 }
 0x721   :  { %v2282_v43 = vpop.eup %2281  ;;  %v1652_v47 = vmul.f32 0.5, %v1644_v49  ;;  %v1658_v50 = vmul.f32 %v2280_v59, %v1650_v46 }
 0x722   :  { %v2284_v6 = vpop.eup %2283  ;;  %v1659_v51 = vmul.f32 %v2282_v43, %v1651_v63  ;;  %v2051_v52 = vpack.c.bf16 %v1657_v44, %v1653_v25 }
 0x723   :  { %v2049_v7 = vpack.c.bf16 %v1658_v50, %v1654_v34  ;;  %v1660_v30 = vmul.f32 %v2284_v6, %v1652_v47 }
 0x724   :  { %v2055_v56 = vpack.c.bf16 %v1659_v51, %v1655_v37 }
 0x725   :  { %2050 = vmatprep.subr.bf16.mxu0 %v2049_v7  ;;  %v2053_v9 = vpack.c.bf16 %v1660_v30, %v1656_v40 }
 0x726   :  { %2052 = vmatpush1.bf16.msra.mxu0 %v2051_v52 }
 0x727   :  { %2054 = vmatprep.subr.bf16.mxu1 %v2053_v9 }
 0x728   :  { %2056 = vmatpush1.bf16.msra.mxu1 %v2055_v56 }
 0x729   :  { %1945 = vmatmul.mubr.msk.f32.vlgmr.msra.gmra.mrb[36].mxu0 %vm624_vm13, %v1941_v62 }
 0x72a   :  { %1753 = vmatprep.mubr.f32.mxu0 %v2285_v2 }
 0x72b   :  { %1947 = vmatmul.mubr.msk.f32.vlgmr.msra.gmra.mrb[36].mxu1 %vm624_vm13, %v1941_v62 }
 0x72c   :  { %1830 = vmatprep.mubr.f32.mxu1 %v2285_v2 }
 0x72d   :  { %1946 = vmatmul.mubr.msk.f32.gmra.mrb[38].mxu0 %vm624_vm13, %v1942_v24 }
 0x72f   :  { %1948 = vmatmul.mubr.msk.f32.gmra.mrb[38].mxu1 %vm624_vm13, %v1942_v24 }
 0x7fc   :  { %v1749_v21 = vpop.f32.mrb[36].mxu0 }
 0x7fd   :  { %v1750_v60 = vadd.f32 %v1749_v21, %v1670_v53  ;;  %v1751_v3 = vpop.f32.mrb[37].mxu0 }
 0x7fe   :  { %v1752_v16 = vadd.f32 %v1751_v3, %v1670_v53  ;;  %v1826_v17 = vpop.f32.mrb[36].mxu1 }
 0x7ff   :  { %v1837_v54 = vadd.f32 %v1750_v60, %v2671_v58  ;;  %v1827_v38 = vadd.f32 %v1826_v17, %v1670_v53  ;;  %v1828_v5 = vpop.f32.mrb[37].mxu1 }
 0x800   :  { %v1838_v22 = vadd.f32 %v1752_v16, %v2678_v18  ;;  %v1829_v61 = vadd.f32 %v1828_v5, %v1670_v53  ;;  %v1755_v11 = vpop.f32.mrb[38].mxu0 }
 0x801   :  { %1845 = vst [vmem:[%s2882_s7] sm:$0xff] %v1837_v54  ;;  %v1839_v2 = vadd.f32 %v1827_v38, %v2685_v1  ;;  %v1756_v57 = vadd.f32 %v1755_v11, %v1675_v20  ;;  %v1757_v0 = vpop.f32.mrb[39].mxu0 }
 0x802   :  { %1846 = vst [vmem:[%s2882_s7 + $0x8] sm:$0xff] %v1838_v22  ;;  %v1840_v58 = vadd.f32 %v1829_v61, %v2690_v19  ;;  %v1758_v36 = vadd.f32 %v1757_v0, %v1675_v20  ;;  %v1832_v27 = vpop.f32.mrb[38].mxu1 }
 0x803   :  { %1847 = vst [vmem:[%s2882_s7 + $0x10] sm:$0xff] %v1839_v2  ;;  %v1841_v18 = vadd.f32 %v1756_v57, %v2721_v13  ;;  %v1833_v41 = vadd.f32 %v1832_v27, %v1675_v20  ;;  %v1834_v10 = vpop.f32.mrb[39].mxu1 }
 0x804   :  { %1848 = vst [vmem:[%s2882_s7 + $0x18] sm:$0xff] %v1840_v58  ;;  %v1842_v1 = vadd.f32 %v1758_v36, %v2724_v14  ;;  %v1835_v55 = vadd.f32 %v1834_v10, %v1675_v20 }
 0x805   :  { %1849 = vst [vmem:[%s2882_s7 + $0x20] sm:$0xff] %v1841_v18  ;;  %v1843_v19 = vadd.f32 %v1833_v41, %v2727_v15 }
 0x806   :  { %1850 = vst [vmem:[%s2882_s7 + $0x28] sm:$0xff] %v1842_v1  ;;  %v1844_v13 = vadd.f32 %v1835_v55, %v2730_v28 }
 0x807   :  { %1851 = vst [vmem:[%s2882_s7 + $0x30] sm:$0xff] %v1843_v19 }
 0x808   :  { %1852 = vst [vmem:[%s2882_s7 + $0x38] sm:$0xff] %v1844_v13 }

</bundles_post_ra>
